<compile_context>
chip_gen: v6e
topology: v6e:2x2x1
jax: 0.10.0
libtpu: 0.0.40
codegen_flags: <defaults>
</compile_context>

<pallas_src>
import functools

import jax
import jax.numpy as jnp
from jax.experimental import pallas as pl
from jax.experimental.pallas import tpu as pltpu

_LN_EPS = 1e-5      # torch.nn.LayerNorm default
_INF = -1e30        # masked_fill value used by the reference


def _layernorm(x, gamma, beta):
    mu = jnp.mean(x, axis=-1, keepdims=True)
    var = jnp.mean((x - mu) ** 2, axis=-1, keepdims=True)
    return (x - mu) * jax.lax.rsqrt(var + _LN_EPS) * gamma + beta


# ---------------------------------------------------------------------------
# One fused kernel: p_attn -> g_attn (x recurrent_steps) -> prediction head.
# Grid is (B,); every grid step processes one full batch row.
# ---------------------------------------------------------------------------
def _fused_kernel(
        # per-batch blocks
        pat_ref, g_ref, pmask_ref, gmask_ref, ex_ref,
        # p_attn weights (query = graph, key = value = pattern)
        pa_qg_ref, pa_qb_ref, pa_kg_ref, pa_kb_ref, pa_vg_ref, pa_vb_ref,
        pa_wq_ref, pa_wk_ref, pa_wv_ref, pa_wo_ref, pa_wg_ref, pa_bg_ref,
        # g_attn weights (query = key = value = graph)
        ga_qg_ref, ga_qb_ref, ga_kg_ref, ga_kb_ref, ga_vg_ref, ga_vb_ref,
        ga_wq_ref, ga_wk_ref, ga_wv_ref, ga_wo_ref, ga_wg_ref, ga_bg_ref,
        # prediction head weights
        plw_ref, plb_ref, glw_ref, glb_ref, w1_ref, b1_ref, w2_ref, b2_ref,
        # output
        o_ref,
        *, num_heads, recurrent_steps):
    p = pat_ref[0]        # (Lp, Dp)
    g = g_ref[0]          # (Lg, Dg)
    pmask = pmask_ref[0]  # (1, Lp)  1.0 = valid key position
    gmask = gmask_ref[0]  # (1, Lg)
    ex = ex_ref[0]        # (1, 4)   [len_p, len_g, 1/len_p, 1/len_g]

    def gated(q, kv, mask, qg, qb, kg, kb, vg, vb, wq_b, wk_b, wv_b, wo_b,
              wg_ref, bg):
        # q: (Lq, Dq)   kv: (M, Dk)   mask: (1, M)
        # wq_b: (nH, Dq, hd)  wk_b/wv_b: (nH, Dk, hd)  wo_b: (nH, hd, Dq)
        # wg_ref: (2*Dq, Dq) ref (row-sliced -> no concatenate)
        nH = num_heads
        Lq, Dq = q.shape
        M, Dk = kv.shape
        hd = wq_b.shape[-1]
        scale = 1.0 / (hd ** 0.5)

        # pre_lnorm: qn is reused by the gate/mix, so keep it explicit.
        qn = _layernorm(q, qg, qb)
        # key == value -> LayerNorm statistics computed once, two affines.
        mu = jnp.mean(kv, axis=-1, keepdims=True)
        var = jnp.mean((kv - mu) ** 2, axis=-1, keepdims=True)
        nrm = (kv - mu) * jax.lax.rsqrt(var + _LN_EPS)
        kn = nrm * kg + kb
        vn = nrm * vg + vb

        # head-batched projections: one batched matmul each (no per-head loop).
        hq = jnp.einsum('nld,ndh->nlh',
                        jnp.broadcast_to(qn[None], (nH, Lq, Dq)), wq_b,
                        preferred_element_type=jnp.float32)        # (nH,Lq,hd)
        hk = jnp.einsum('nmd,ndh->nmh',
                        jnp.broadcast_to(kn[None], (nH, M, Dk)), wk_b,
                        preferred_element_type=jnp.float32)        # (nH,M,hd)
        hv = jnp.einsum('nmd,ndh->nmh',
                        jnp.broadcast_to(vn[None], (nH, M, Dk)), wv_b,
                        preferred_element_type=jnp.float32)        # (nH,M,hd)

        score = jnp.einsum('nlh,nmh->nlm', hq, hk,
                           preferred_element_type=jnp.float32) * scale
        score = jnp.where(mask[None, :, :] > 0.0, score, _INF)     # masked_fill

        # nn.Softmax(dim=-1) on the 'bijn' tensor == softmax over the HEAD axis.
        mx = jnp.max(score, axis=0, keepdims=True)
        e = jnp.exp(score - mx)
        prob = e * pl.reciprocal(jnp.sum(e, axis=0, keepdims=True), approx=True)

        attn = jnp.einsum('nlm,nmh->nlh', prob, hv,
                          preferred_element_type=jnp.float32)       # (nH,Lq,hd)
        attn_out = jnp.sum(
            jnp.einsum('nlh,nhd->nld', attn, wo_b,
                       preferred_element_type=jnp.float32), axis=0)  # (Lq,Dq)

        # gate = sigmoid([qn, attn_out] @ wg + bg) via split-weight matmuls.
        gate = jax.nn.sigmoid(
            jnp.dot(qn, wg_ref[0:Dq, :], preferred_element_type=jnp.float32)
            + jnp.dot(attn_out, wg_ref[Dq:2 * Dq, :],
                      preferred_element_type=jnp.float32)
            + bg)
        return gate * qn + (1.0 - gate) * attn_out

    pa_w = (pa_qg_ref[...], pa_qb_ref[...], pa_kg_ref[...], pa_kb_ref[...],
            pa_vg_ref[...], pa_vb_ref[...], pa_wq_ref[...], pa_wk_ref[...],
            pa_wv_ref[...], pa_wo_ref[...], pa_wg_ref, pa_bg_ref[...])
    ga_w = (ga_qg_ref[...], ga_qb_ref[...], ga_kg_ref[...], ga_kb_ref[...],
            ga_vg_ref[...], ga_vb_ref[...], ga_wq_ref[...], ga_wk_ref[...],
            ga_wv_ref[...], ga_wo_ref[...], ga_wg_ref, ga_bg_ref[...])

    for _ in range(recurrent_steps):
        g = gated(g, p, pmask, *pa_w)
        g = gated(g, g, gmask, *ga_w)

    # ---------------- prediction head ----------------
    H = plb_ref.shape[-1]
    p_vec = (jnp.dot(jnp.sum(p, axis=0, keepdims=True), plw_ref[...],
                     preferred_element_type=jnp.float32)
             + plb_ref[...])                                         # (1, H)
    g_vec = jnp.sum(jnp.dot(g, glw_ref[...],
                            preferred_element_type=jnp.float32) + glb_ref[...],
                    axis=0, keepdims=True)                           # (1, H)

    # pred_layer1([p, g, g-p, g*p, lens]) via split-weight matmuls (no concat).
    y = (jnp.dot(p_vec, w1_ref[0:H, :], preferred_element_type=jnp.float32)
         + jnp.dot(g_vec, w1_ref[H:2 * H, :], preferred_element_type=jnp.float32)
         + jnp.dot(g_vec - p_vec, w1_ref[2 * H:3 * H, :],
                   preferred_element_type=jnp.float32)
         + jnp.dot(g_vec * p_vec, w1_ref[3 * H:4 * H, :],
                   preferred_element_type=jnp.float32)
         + jnp.dot(ex, w1_ref[4 * H:4 * H + 4, :],
                   preferred_element_type=jnp.float32)
         + b1_ref[...])
    y = jnp.maximum(y, 0.0)                                          # relu
    # pred_layer2([y, lens]) via split-weight matmuls.
    y = (jnp.dot(y, w2_ref[0:H, :], preferred_element_type=jnp.float32)
         + jnp.dot(ex, w2_ref[H:H + 4, :], preferred_element_type=jnp.float32)
         + b2_ref[...])                                              # (1, 1)

    # lane-dense output slab; the wrapper slices lane 0.
    o_ref[0] = jnp.broadcast_to(y, (1, o_ref.shape[-1]))


# ---------------------------------------------------------------------------
# Wrapper: one pallas_call over grid=(B,) with all weights resident.
# ---------------------------------------------------------------------------
def sum_attn_predict_forward(params, pattern, pattern_len, graph, graph_len,
                             *, num_heads=4, recurrent_steps=1):
    B, Lp, Dp = pattern.shape
    _, Lg, Dg = graph.shape
    H = params['p_layer_w'].shape[1]
    hd = H // num_heads

    plen = pattern_len.reshape(B, 1)
    glen = graph_len.reshape(B, 1)
    # TODO(synk): PyTorch passes attn_mask=None when the padded length differs
    # from max(len); here the length mask is always applied (identical whenever
    # padded length == max(len), as in this example and in normal batching).
    pmask = (jnp.arange(Lp)[None, :] < plen).astype(jnp.float32).reshape(B, 1, Lp)
    gmask = (jnp.arange(Lg)[None, :] < glen).astype(jnp.float32).reshape(B, 1, Lg)

    plf = plen.astype(jnp.float32)
    glf = glen.astype(jnp.float32)
    extras = jnp.concatenate([plf, glf, 1.0 / plf, 1.0 / glf],
                             axis=1).reshape(B, 1, 4)

    def head_major(w):                       # (Din, H) -> (nH, Din, hd)
        return w.reshape(w.shape[0], num_heads, hd).transpose(1, 0, 2)

    def attn_weights(pr):
        return [pr['q_ln_g'], pr['q_ln_b'], pr['k_ln_g'], pr['k_ln_b'],
                pr['v_ln_g'], pr['v_ln_b'],
                head_major(pr['wq']), head_major(pr['wk']), head_major(pr['wv']),
                pr['wo'].reshape(num_heads, hd, -1),
                pr['wg'], pr['bg']]

    weights = (attn_weights(params['p_attn']) + attn_weights(params['g_attn'])
               + [params['p_layer_w'], params['p_layer_b'],
                  params['g_layer_w'], params['g_layer_b'],
                  params['pred1_w'], params['pred1_b'],
                  params['pred2_w'], params['pred2_b']])

    def batch_spec(shape):                   # per-batch block (1, ...full dims)
        return pl.BlockSpec((1,) + tuple(shape[1:]),
                            lambda b, n=len(shape) - 1: (b,) + (0,) * n)

    def const_spec(w):                       # full-array block, loaded once
        return pl.BlockSpec(tuple(w.shape), lambda b, n=w.ndim: (0,) * n)

    in_specs = ([batch_spec(pattern.shape), batch_spec(graph.shape),
                 batch_spec(pmask.shape), batch_spec(gmask.shape),
                 batch_spec(extras.shape)]
                + [const_spec(w) for w in weights])

    out_lanes = 128
    kernel = functools.partial(_fused_kernel, num_heads=num_heads,
                               recurrent_steps=recurrent_steps)
    out = pl.pallas_call(
        kernel,
        out_shape=jax.ShapeDtypeStruct((B, 1, out_lanes), jnp.float32),
        grid=(B,),
        in_specs=in_specs,
        out_specs=pl.BlockSpec((1, 1, out_lanes), lambda b: (b, 0, 0)),
        compiler_params=pltpu.CompilerParams(
            dimension_semantics=("parallel",)),
    )(pattern, graph, pmask, gmask, extras, *weights)
    return out[:, 0, :1]                     # (B, 1)


# ---------------------------------------------------------------------------
# Deterministic parameter init (shapes / init follow the PyTorch __init__).
# ---------------------------------------------------------------------------
def init_params(key, pattern_dim, graph_dim, hidden_dim, num_heads):
    head_dim = hidden_dim // num_heads
    a_scale = 1.0 / head_dim ** 0.5
    h_scale = 1.0 / hidden_dim ** 0.5
    keys = iter(jax.random.split(key, 32))

    def nrm(shape, s):
        return s * jax.random.normal(next(keys), shape, dtype=jnp.float32)

    def attn_params(qdim, kdim):
        return dict(
            q_ln_g=jnp.ones((1, qdim), jnp.float32), q_ln_b=jnp.zeros((1, qdim), jnp.float32),
            k_ln_g=jnp.ones((1, kdim), jnp.float32), k_ln_b=jnp.zeros((1, kdim), jnp.float32),
            v_ln_g=jnp.ones((1, kdim), jnp.float32), v_ln_b=jnp.zeros((1, kdim), jnp.float32),
            wq=nrm((qdim, hidden_dim), a_scale), wk=nrm((kdim, hidden_dim), a_scale),
            wv=nrm((kdim, hidden_dim), a_scale), wo=nrm((hidden_dim, qdim), a_scale),
            wg=nrm((2 * qdim, qdim), a_scale), bg=jnp.ones((1, qdim), jnp.float32))

    return dict(
        p_layer_w=nrm((pattern_dim, hidden_dim), h_scale),
        p_layer_b=jnp.zeros((1, hidden_dim), jnp.float32),
        g_layer_w=nrm((graph_dim, hidden_dim), h_scale),
        g_layer_b=jnp.zeros((1, hidden_dim), jnp.float32),
        p_attn=attn_params(graph_dim, pattern_dim),   # query=graph, key/value=pattern
        g_attn=attn_params(graph_dim, graph_dim),     # query=key=value=graph
        pred1_w=nrm((hidden_dim * 4 + 4, hidden_dim), h_scale),
        pred1_b=jnp.zeros((1, hidden_dim), jnp.float32),
        # PyTorch zero-inits pred_layer2 (output would be identically 0);
        # small random values are used so the kernel output is non-trivial.
        pred2_w=nrm((hidden_dim + 4, 1), h_scale),
        pred2_b=jnp.zeros((1, 1), jnp.float32))


# ---------------------------------------------------------------------------
# Pure-JAX reference (mirrors the PyTorch forward) for correctness checking.
# ---------------------------------------------------------------------------
def ref_forward(params, pattern, pattern_len, graph, graph_len,
                *, num_heads, recurrent_steps):
    def layernorm(x, g_, b_):
        mu = jnp.mean(x, axis=-1, keepdims=True)
        var = jnp.mean((x - mu) ** 2, axis=-1, keepdims=True)
        return (x - mu) / jnp.sqrt(var + _LN_EPS) * g_ + b_

    def gated(query, key, value, mask, pr):
        B, Lq, Dq = query.shape
        H = pr['wq'].shape[1]
        hd = H // num_heads
        qn = layernorm(query, pr['q_ln_g'], pr['q_ln_b'])
        kn = layernorm(key, pr['k_ln_g'], pr['k_ln_b'])
        vn = layernorm(value, pr['v_ln_g'], pr['v_ln_b'])
        hq = (qn @ pr['wq']).reshape(B, Lq, num_heads, hd)
        hk = (kn @ pr['wk']).reshape(B, -1, num_heads, hd)
        hv = (vn @ pr['wv']).reshape(B, -1, num_heads, hd)
        score = jnp.einsum('bind,bjnd->bijn', hq, hk) / hd ** 0.5
        if mask is not None:
            score = jnp.where(mask[:, None, :, None] != 0, score, _INF)
        prob = jax.nn.softmax(score, axis=-1)      # nn.Softmax(dim=-1) over heads
        av = jnp.einsum('bijn,bjnd->bind', prob, hv).reshape(B, Lq, H)
        ao = av @ pr['wo']
        gate = jax.nn.sigmoid(jnp.concatenate([qn, ao], axis=-1) @ pr['wg'] + pr['bg'])
        return gate * qn + (1.0 - gate) * ao

    B, Lp = pattern.shape[0], pattern.shape[1]
    Lg = graph.shape[1]
    plen = pattern_len.reshape(B, 1)
    glen = graph_len.reshape(B, 1)
    pmask = (jnp.arange(Lp)[None, :] < plen).astype(jnp.float32)
    gmask = (jnp.arange(Lg)[None, :] < glen).astype(jnp.float32)

    p, g = pattern, graph
    for _ in range(recurrent_steps):
        g = gated(g, p, p, pmask, params['p_attn'])
        g = gated(g, g, g, gmask, params['g_attn'])

    plf = plen.astype(jnp.float32)
    glf = glen.astype(jnp.float32)
    pv = jnp.sum(pattern, axis=1) @ params['p_layer_w'] + params['p_layer_b']
    gv = jnp.sum(g @ params['g_layer_w'] + params['g_layer_b'], axis=1)
    feat = jnp.concatenate([pv, gv, gv - pv, gv * pv,
                            plf, glf, 1.0 / plf, 1.0 / glf], axis=1)
    y = jnp.maximum(feat @ params['pred1_w'] + params['pred1_b'], 0.0)
    y = jnp.concatenate([y, plf, glf, 1.0 / plf, 1.0 / glf], axis=1)
    return y @ params['pred2_w'] + params['pred2_b']


if __name__ == "__main__":
    B, Lp, Lg = 2, 10, 12
    pattern_dim, graph_dim, hidden_dim = 16, 24, 32
    num_heads, recurrent_steps = 4, 1

    key = jax.random.PRNGKey(0)
    kp, kgr, kw = jax.random.split(key, 3)
    pattern = jax.random.normal(kp, (B, Lp, pattern_dim), dtype=jnp.float32)
    graph = jax.random.normal(kgr, (B, Lg, graph_dim), dtype=jnp.float32)
    # full-length sequences -> PyTorch's mask path is a no-op (see TODO above)
    pattern_len = jnp.full((B, 1), Lp, dtype=jnp.int32)
    graph_len = jnp.full((B, 1), Lg, dtype=jnp.int32)

    params = init_params(kw, pattern_dim, graph_dim, hidden_dim, num_heads)

    fwd = jax.jit(functools.partial(sum_attn_predict_forward,
                                    num_heads=num_heads,
                                    recurrent_steps=recurrent_steps))
    y = jax.block_until_ready(fwd(params, pattern, pattern_len, graph, graph_len))

    y_ref = ref_forward(params, pattern, pattern_len, graph, graph_len,
                        num_heads=num_heads, recurrent_steps=recurrent_steps)

    assert y.shape == (B, 1), y.shape
    assert jnp.allclose(y, y_ref, atol=1e-2, rtol=1e-2), (y, y_ref)
    print("KERNEL_OK")
</pallas_src>

<mosaic_0001>
module attributes {stable_mosaic.version = 11 : i64} {
  func.func @_fused_kernel(%arg0: i32, %arg1: memref<1x10x16xf32, #tpu.memory_space<vmem>>, %arg2: memref<1x12x24xf32, #tpu.memory_space<vmem>>, %arg3: memref<1x1x10xf32, #tpu.memory_space<vmem>>, %arg4: memref<1x1x12xf32, #tpu.memory_space<vmem>>, %arg5: memref<1x1x4xf32, #tpu.memory_space<vmem>>, %arg6: memref<1x24xf32, #tpu.memory_space<vmem>>, %arg7: memref<1x24xf32, #tpu.memory_space<vmem>>, %arg8: memref<1x16xf32, #tpu.memory_space<vmem>>, %arg9: memref<1x16xf32, #tpu.memory_space<vmem>>, %arg10: memref<1x16xf32, #tpu.memory_space<vmem>>, %arg11: memref<1x16xf32, #tpu.memory_space<vmem>>, %arg12: memref<4x24x8xf32, #tpu.memory_space<vmem>>, %arg13: memref<4x16x8xf32, #tpu.memory_space<vmem>>, %arg14: memref<4x16x8xf32, #tpu.memory_space<vmem>>, %arg15: memref<4x8x24xf32, #tpu.memory_space<vmem>>, %arg16: memref<48x24xf32, #tpu.memory_space<vmem>>, %arg17: memref<1x24xf32, #tpu.memory_space<vmem>>, %arg18: memref<1x24xf32, #tpu.memory_space<vmem>>, %arg19: memref<1x24xf32, #tpu.memory_space<vmem>>, %arg20: memref<1x24xf32, #tpu.memory_space<vmem>>, %arg21: memref<1x24xf32, #tpu.memory_space<vmem>>, %arg22: memref<1x24xf32, #tpu.memory_space<vmem>>, %arg23: memref<1x24xf32, #tpu.memory_space<vmem>>, %arg24: memref<4x24x8xf32, #tpu.memory_space<vmem>>, %arg25: memref<4x24x8xf32, #tpu.memory_space<vmem>>, %arg26: memref<4x24x8xf32, #tpu.memory_space<vmem>>, %arg27: memref<4x8x24xf32, #tpu.memory_space<vmem>>, %arg28: memref<48x24xf32, #tpu.memory_space<vmem>>, %arg29: memref<1x24xf32, #tpu.memory_space<vmem>>, %arg30: memref<16x32xf32, #tpu.memory_space<vmem>>, %arg31: memref<1x32xf32, #tpu.memory_space<vmem>>, %arg32: memref<24x32xf32, #tpu.memory_space<vmem>>, %arg33: memref<1x32xf32, #tpu.memory_space<vmem>>, %arg34: memref<132x32xf32, #tpu.memory_space<vmem>>, %arg35: memref<1x32xf32, #tpu.memory_space<vmem>>, %arg36: memref<36x1xf32, #tpu.memory_space<vmem>>, %arg37: memref<1x1xf32, #tpu.memory_space<vmem>>, %arg38: memref<1x1x128xf32, #tpu.memory_space<vmem>>) attributes {dimension_semantics = [#tpu.dimension_semantics<parallel>], iteration_bounds = array<i64: 2>, scalar_prefetch = 0 : i64, scratch_operands = 0 : i64, tpu.core_type = #tpu.core_type<tc>, window_params = [{transform_indices = @transform_0, window_bounds = array<i64: 1, 10, 16>}, {transform_indices = @transform_1, window_bounds = array<i64: 1, 12, 24>}, {transform_indices = @transform_2, window_bounds = array<i64: 1, 1, 10>}, {transform_indices = @transform_3, window_bounds = array<i64: 1, 1, 12>}, {transform_indices = @transform_4, window_bounds = array<i64: 1, 1, 4>}, {pipeline_mode = #tpu.pipeline_mode<synchronous>, transform_indices = @transform_5, window_bounds = array<i64: 1, 24>}, {pipeline_mode = #tpu.pipeline_mode<synchronous>, transform_indices = @transform_6, window_bounds = array<i64: 1, 24>}, {pipeline_mode = #tpu.pipeline_mode<synchronous>, transform_indices = @transform_7, window_bounds = array<i64: 1, 16>}, {pipeline_mode = #tpu.pipeline_mode<synchronous>, transform_indices = @transform_8, window_bounds = array<i64: 1, 16>}, {pipeline_mode = #tpu.pipeline_mode<synchronous>, transform_indices = @transform_9, window_bounds = array<i64: 1, 16>}, {pipeline_mode = #tpu.pipeline_mode<synchronous>, transform_indices = @transform_10, window_bounds = array<i64: 1, 16>}, {pipeline_mode = #tpu.pipeline_mode<synchronous>, transform_indices = @transform_11, window_bounds = array<i64: 4, 24, 8>}, {pipeline_mode = #tpu.pipeline_mode<synchronous>, transform_indices = @transform_12, window_bounds = array<i64: 4, 16, 8>}, {pipeline_mode = #tpu.pipeline_mode<synchronous>, transform_indices = @transform_13, window_bounds = array<i64: 4, 16, 8>}, {pipeline_mode = #tpu.pipeline_mode<synchronous>, transform_indices = @transform_14, window_bounds = array<i64: 4, 8, 24>}, {pipeline_mode = #tpu.pipeline_mode<synchronous>, transform_indices = @transform_15, window_bounds = array<i64: 48, 24>}, {pipeline_mode = #tpu.pipeline_mode<synchronous>, transform_indices = @transform_16, window_bounds = array<i64: 1, 24>}, {pipeline_mode = #tpu.pipeline_mode<synchronous>, transform_indices = @transform_17, window_bounds = array<i64: 1, 24>}, {pipeline_mode = #tpu.pipeline_mode<synchronous>, transform_indices = @transform_18, window_bounds = array<i64: 1, 24>}, {pipeline_mode = #tpu.pipeline_mode<synchronous>, transform_indices = @transform_19, window_bounds = array<i64: 1, 24>}, {pipeline_mode = #tpu.pipeline_mode<synchronous>, transform_indices = @transform_20, window_bounds = array<i64: 1, 24>}, {pipeline_mode = #tpu.pipeline_mode<synchronous>, transform_indices = @transform_21, window_bounds = array<i64: 1, 24>}, {pipeline_mode = #tpu.pipeline_mode<synchronous>, transform_indices = @transform_22, window_bounds = array<i64: 1, 24>}, {pipeline_mode = #tpu.pipeline_mode<synchronous>, transform_indices = @transform_23, window_bounds = array<i64: 4, 24, 8>}, {pipeline_mode = #tpu.pipeline_mode<synchronous>, transform_indices = @transform_24, window_bounds = array<i64: 4, 24, 8>}, {pipeline_mode = #tpu.pipeline_mode<synchronous>, transform_indices = @transform_25, window_bounds = array<i64: 4, 24, 8>}, {pipeline_mode = #tpu.pipeline_mode<synchronous>, transform_indices = @transform_26, window_bounds = array<i64: 4, 8, 24>}, {pipeline_mode = #tpu.pipeline_mode<synchronous>, transform_indices = @transform_27, window_bounds = array<i64: 48, 24>}, {pipeline_mode = #tpu.pipeline_mode<synchronous>, transform_indices = @transform_28, window_bounds = array<i64: 1, 24>}, {pipeline_mode = #tpu.pipeline_mode<synchronous>, transform_indices = @transform_29, window_bounds = array<i64: 16, 32>}, {pipeline_mode = #tpu.pipeline_mode<synchronous>, transform_indices = @transform_30, window_bounds = array<i64: 1, 32>}, {pipeline_mode = #tpu.pipeline_mode<synchronous>, transform_indices = @transform_31, window_bounds = array<i64: 24, 32>}, {pipeline_mode = #tpu.pipeline_mode<synchronous>, transform_indices = @transform_32, window_bounds = array<i64: 1, 32>}, {pipeline_mode = #tpu.pipeline_mode<synchronous>, transform_indices = @transform_33, window_bounds = array<i64: 132, 32>}, {pipeline_mode = #tpu.pipeline_mode<synchronous>, transform_indices = @transform_34, window_bounds = array<i64: 1, 32>}, {pipeline_mode = #tpu.pipeline_mode<synchronous>, transform_indices = @transform_35, window_bounds = array<i64: 36, 1>}, {pipeline_mode = #tpu.pipeline_mode<synchronous>, transform_indices = @transform_36, window_bounds = array<i64: 1, 1>}, {transform_indices = @transform_37, window_bounds = array<i64: 1, 1, 128>}]} {
    %c0 = arith.constant 0 : index
    %c0_0 = arith.constant 0 : index
    %c0_1 = arith.constant 0 : index
    %0 = vector.load %arg1[%c0, %c0_0, %c0_1] : memref<1x10x16xf32, #tpu.memory_space<vmem>>, vector<1x10x16xf32>
    %1 = vector.shape_cast %0 : vector<1x10x16xf32> to vector<10x16xf32>
    %c0_2 = arith.constant 0 : index
    %c0_3 = arith.constant 0 : index
    %c0_4 = arith.constant 0 : index
    %2 = vector.load %arg2[%c0_2, %c0_3, %c0_4] : memref<1x12x24xf32, #tpu.memory_space<vmem>>, vector<1x12x24xf32>
    %3 = vector.shape_cast %2 : vector<1x12x24xf32> to vector<12x24xf32>
    %c0_5 = arith.constant 0 : index
    %c0_6 = arith.constant 0 : index
    %c0_7 = arith.constant 0 : index
    %4 = vector.load %arg3[%c0_5, %c0_6, %c0_7] : memref<1x1x10xf32, #tpu.memory_space<vmem>>, vector<1x1x10xf32>
    %5 = vector.shape_cast %4 : vector<1x1x10xf32> to vector<1x10xf32>
    %c0_8 = arith.constant 0 : index
    %c0_9 = arith.constant 0 : index
    %c0_10 = arith.constant 0 : index
    %6 = vector.load %arg4[%c0_8, %c0_9, %c0_10] : memref<1x1x12xf32, #tpu.memory_space<vmem>>, vector<1x1x12xf32>
    %7 = vector.shape_cast %6 : vector<1x1x12xf32> to vector<1x12xf32>
    %c0_11 = arith.constant 0 : index
    %c0_12 = arith.constant 0 : index
    %c0_13 = arith.constant 0 : index
    %8 = vector.load %arg5[%c0_11, %c0_12, %c0_13] : memref<1x1x4xf32, #tpu.memory_space<vmem>>, vector<1x1x4xf32>
    %9 = vector.shape_cast %8 : vector<1x1x4xf32> to vector<1x4xf32>
    %c0_14 = arith.constant 0 : index
    %c0_15 = arith.constant 0 : index
    %10 = vector.load %arg6[%c0_14, %c0_15] : memref<1x24xf32, #tpu.memory_space<vmem>>, vector<1x24xf32>
    %c0_16 = arith.constant 0 : index
    %c0_17 = arith.constant 0 : index
    %11 = vector.load %arg7[%c0_16, %c0_17] : memref<1x24xf32, #tpu.memory_space<vmem>>, vector<1x24xf32>
    %c0_18 = arith.constant 0 : index
    %c0_19 = arith.constant 0 : index
    %12 = vector.load %arg8[%c0_18, %c0_19] : memref<1x16xf32, #tpu.memory_space<vmem>>, vector<1x16xf32>
    %c0_20 = arith.constant 0 : index
    %c0_21 = arith.constant 0 : index
    %13 = vector.load %arg9[%c0_20, %c0_21] : memref<1x16xf32, #tpu.memory_space<vmem>>, vector<1x16xf32>
    %c0_22 = arith.constant 0 : index
    %c0_23 = arith.constant 0 : index
    %14 = vector.load %arg10[%c0_22, %c0_23] : memref<1x16xf32, #tpu.memory_space<vmem>>, vector<1x16xf32>
    %c0_24 = arith.constant 0 : index
    %c0_25 = arith.constant 0 : index
    %15 = vector.load %arg11[%c0_24, %c0_25] : memref<1x16xf32, #tpu.memory_space<vmem>>, vector<1x16xf32>
    %c0_26 = arith.constant 0 : index
    %c0_27 = arith.constant 0 : index
    %c0_28 = arith.constant 0 : index
    %16 = vector.load %arg12[%c0_26, %c0_27, %c0_28] : memref<4x24x8xf32, #tpu.memory_space<vmem>>, vector<4x24x8xf32>
    %c0_29 = arith.constant 0 : index
    %c0_30 = arith.constant 0 : index
    %c0_31 = arith.constant 0 : index
    %17 = vector.load %arg13[%c0_29, %c0_30, %c0_31] : memref<4x16x8xf32, #tpu.memory_space<vmem>>, vector<4x16x8xf32>
    %c0_32 = arith.constant 0 : index
    %c0_33 = arith.constant 0 : index
    %c0_34 = arith.constant 0 : index
    %18 = vector.load %arg14[%c0_32, %c0_33, %c0_34] : memref<4x16x8xf32, #tpu.memory_space<vmem>>, vector<4x16x8xf32>
    %c0_35 = arith.constant 0 : index
    %c0_36 = arith.constant 0 : index
    %c0_37 = arith.constant 0 : index
    %19 = vector.load %arg15[%c0_35, %c0_36, %c0_37] : memref<4x8x24xf32, #tpu.memory_space<vmem>>, vector<4x8x24xf32>
    %c0_38 = arith.constant 0 : index
    %c0_39 = arith.constant 0 : index
    %20 = vector.load %arg17[%c0_38, %c0_39] : memref<1x24xf32, #tpu.memory_space<vmem>>, vector<1x24xf32>
    %c0_40 = arith.constant 0 : index
    %c0_41 = arith.constant 0 : index
    %21 = vector.load %arg18[%c0_40, %c0_41] : memref<1x24xf32, #tpu.memory_space<vmem>>, vector<1x24xf32>
    %c0_42 = arith.constant 0 : index
    %c0_43 = arith.constant 0 : index
    %22 = vector.load %arg19[%c0_42, %c0_43] : memref<1x24xf32, #tpu.memory_space<vmem>>, vector<1x24xf32>
    %c0_44 = arith.constant 0 : index
    %c0_45 = arith.constant 0 : index
    %23 = vector.load %arg20[%c0_44, %c0_45] : memref<1x24xf32, #tpu.memory_space<vmem>>, vector<1x24xf32>
    %c0_46 = arith.constant 0 : index
    %c0_47 = arith.constant 0 : index
    %24 = vector.load %arg21[%c0_46, %c0_47] : memref<1x24xf32, #tpu.memory_space<vmem>>, vector<1x24xf32>
    %c0_48 = arith.constant 0 : index
    %c0_49 = arith.constant 0 : index
    %25 = vector.load %arg22[%c0_48, %c0_49] : memref<1x24xf32, #tpu.memory_space<vmem>>, vector<1x24xf32>
    %c0_50 = arith.constant 0 : index
    %c0_51 = arith.constant 0 : index
    %26 = vector.load %arg23[%c0_50, %c0_51] : memref<1x24xf32, #tpu.memory_space<vmem>>, vector<1x24xf32>
    %c0_52 = arith.constant 0 : index
    %c0_53 = arith.constant 0 : index
    %c0_54 = arith.constant 0 : index
    %27 = vector.load %arg24[%c0_52, %c0_53, %c0_54] : memref<4x24x8xf32, #tpu.memory_space<vmem>>, vector<4x24x8xf32>
    %c0_55 = arith.constant 0 : index
    %c0_56 = arith.constant 0 : index
    %c0_57 = arith.constant 0 : index
    %28 = vector.load %arg25[%c0_55, %c0_56, %c0_57] : memref<4x24x8xf32, #tpu.memory_space<vmem>>, vector<4x24x8xf32>
    %c0_58 = arith.constant 0 : index
    %c0_59 = arith.constant 0 : index
    %c0_60 = arith.constant 0 : index
    %29 = vector.load %arg26[%c0_58, %c0_59, %c0_60] : memref<4x24x8xf32, #tpu.memory_space<vmem>>, vector<4x24x8xf32>
    %c0_61 = arith.constant 0 : index
    %c0_62 = arith.constant 0 : index
    %c0_63 = arith.constant 0 : index
    %30 = vector.load %arg27[%c0_61, %c0_62, %c0_63] : memref<4x8x24xf32, #tpu.memory_space<vmem>>, vector<4x8x24xf32>
    %c0_64 = arith.constant 0 : index
    %c0_65 = arith.constant 0 : index
    %31 = vector.load %arg29[%c0_64, %c0_65] : memref<1x24xf32, #tpu.memory_space<vmem>>, vector<1x24xf32>
    %cst = arith.constant dense<0.000000e+00> : vector<12xf32>
    %32 = vector.multi_reduction <add>, %3, %cst [1] : vector<12x24xf32> to vector<12xf32>
    %33 = vector.shape_cast %32 : vector<12xf32> to vector<12x1xf32>
    %cst_66 = arith.constant 2.400000e+01 : f32
    %34 = vector.broadcast %cst_66 : f32 to vector<12x1xf32>
    %35 = arith.divf %33, %34 : vector<12x1xf32>
    %36 = vector.broadcast %35 : vector<12x1xf32> to vector<12x24xf32>
    %37 = arith.subf %3, %36 : vector<12x24xf32>
    %38 = arith.mulf %37, %37 : vector<12x24xf32>
    %cst_67 = arith.constant dense<0.000000e+00> : vector<12xf32>
    %39 = vector.multi_reduction <add>, %38, %cst_67 [1] : vector<12x24xf32> to vector<12xf32>
    %40 = vector.shape_cast %39 : vector<12xf32> to vector<12x1xf32>
    %cst_68 = arith.constant 2.400000e+01 : f32
    %41 = vector.broadcast %cst_68 : f32 to vector<12x1xf32>
    %42 = arith.divf %40, %41 : vector<12x1xf32>
    %43 = vector.broadcast %35 : vector<12x1xf32> to vector<12x24xf32>
    %44 = arith.subf %3, %43 : vector<12x24xf32>
    %cst_69 = arith.constant 9.99999974E-6 : f32
    %45 = vector.broadcast %cst_69 : f32 to vector<12x1xf32>
    %46 = arith.addf %42, %45 : vector<12x1xf32>
    %47 = math.rsqrt %46 : vector<12x1xf32>
    %48 = vector.broadcast %47 : vector<12x1xf32> to vector<12x24xf32>
    %49 = arith.mulf %44, %48 : vector<12x24xf32>
    %50 = vector.broadcast %10 : vector<1x24xf32> to vector<12x24xf32>
    %51 = arith.mulf %49, %50 : vector<12x24xf32>
    %52 = vector.broadcast %11 : vector<1x24xf32> to vector<12x24xf32>
    %53 = arith.addf %51, %52 : vector<12x24xf32>
    %cst_70 = arith.constant dense<0.000000e+00> : vector<10xf32>
    %54 = vector.multi_reduction <add>, %1, %cst_70 [1] : vector<10x16xf32> to vector<10xf32>
    %55 = vector.shape_cast %54 : vector<10xf32> to vector<10x1xf32>
    %cst_71 = arith.constant 1.600000e+01 : f32
    %56 = vector.broadcast %cst_71 : f32 to vector<10x1xf32>
    %57 = arith.divf %55, %56 : vector<10x1xf32>
    %58 = vector.broadcast %57 : vector<10x1xf32> to vector<10x16xf32>
    %59 = arith.subf %1, %58 : vector<10x16xf32>
    %60 = arith.mulf %59, %59 : vector<10x16xf32>
    %cst_72 = arith.constant dense<0.000000e+00> : vector<10xf32>
    %61 = vector.multi_reduction <add>, %60, %cst_72 [1] : vector<10x16xf32> to vector<10xf32>
    %62 = vector.shape_cast %61 : vector<10xf32> to vector<10x1xf32>
    %cst_73 = arith.constant 1.600000e+01 : f32
    %63 = vector.broadcast %cst_73 : f32 to vector<10x1xf32>
    %64 = arith.divf %62, %63 : vector<10x1xf32>
    %65 = vector.broadcast %57 : vector<10x1xf32> to vector<10x16xf32>
    %66 = arith.subf %1, %65 : vector<10x16xf32>
    %cst_74 = arith.constant 9.99999974E-6 : f32
    %67 = vector.broadcast %cst_74 : f32 to vector<10x1xf32>
    %68 = arith.addf %64, %67 : vector<10x1xf32>
    %69 = math.rsqrt %68 : vector<10x1xf32>
    %70 = vector.broadcast %69 : vector<10x1xf32> to vector<10x16xf32>
    %71 = arith.mulf %66, %70 : vector<10x16xf32>
    %72 = vector.broadcast %12 : vector<1x16xf32> to vector<10x16xf32>
    %73 = arith.mulf %71, %72 : vector<10x16xf32>
    %74 = vector.broadcast %13 : vector<1x16xf32> to vector<10x16xf32>
    %75 = arith.addf %73, %74 : vector<10x16xf32>
    %76 = vector.broadcast %14 : vector<1x16xf32> to vector<10x16xf32>
    %77 = arith.mulf %71, %76 : vector<10x16xf32>
    %78 = vector.broadcast %15 : vector<1x16xf32> to vector<10x16xf32>
    %79 = arith.addf %77, %78 : vector<10x16xf32>
    %80 = vector.shape_cast %53 : vector<12x24xf32> to vector<1x12x24xf32>
    %81 = vector.shape_cast %80 : vector<1x12x24xf32> to vector<1x12x24xf32>
    %82 = vector.broadcast %81 : vector<1x12x24xf32> to vector<4x12x24xf32>
    "tpu.trace_start"() <{level = 10 : i32, message = "nld,ndh->nlh"}> : () -> ()
    %cst_75 = arith.constant dense<0.000000e+00> : vector<4x12x8xf32>
    %83 = tpu.matmul %82, %16, %cst_75 {dimension_numbers = #tpu.dot_dimension_numbers<[2], [1], [1], [2], [0, 0, 0, 1, 1, 2], [0], [0]>} : vector<4x12x24xf32>, vector<4x24x8xf32>, vector<4x12x8xf32> -> vector<4x12x8xf32>
    "tpu.trace_stop"() : () -> ()
    %84 = vector.shape_cast %75 : vector<10x16xf32> to vector<1x10x16xf32>
    %85 = vector.shape_cast %84 : vector<1x10x16xf32> to vector<1x10x16xf32>
    %86 = vector.broadcast %85 : vector<1x10x16xf32> to vector<4x10x16xf32>
    "tpu.trace_start"() <{level = 10 : i32, message = "nmd,ndh->nmh"}> : () -> ()
    %cst_76 = arith.constant dense<0.000000e+00> : vector<4x10x8xf32>
    %87 = tpu.matmul %86, %17, %cst_76 {dimension_numbers = #tpu.dot_dimension_numbers<[2], [1], [1], [2], [0, 0, 0, 1, 1, 2], [0], [0]>} : vector<4x10x16xf32>, vector<4x16x8xf32>, vector<4x10x8xf32> -> vector<4x10x8xf32>
    "tpu.trace_stop"() : () -> ()
    %88 = vector.shape_cast %79 : vector<10x16xf32> to vector<1x10x16xf32>
    %89 = vector.shape_cast %88 : vector<1x10x16xf32> to vector<1x10x16xf32>
    %90 = vector.broadcast %89 : vector<1x10x16xf32> to vector<4x10x16xf32>
    "tpu.trace_start"() <{level = 10 : i32, message = "nmd,ndh->nmh"}> : () -> ()
    %cst_77 = arith.constant dense<0.000000e+00> : vector<4x10x8xf32>
    %91 = tpu.matmul %90, %18, %cst_77 {dimension_numbers = #tpu.dot_dimension_numbers<[2], [1], [1], [2], [0, 0, 0, 1, 1, 2], [0], [0]>} : vector<4x10x16xf32>, vector<4x16x8xf32>, vector<4x10x8xf32> -> vector<4x10x8xf32>
    "tpu.trace_stop"() : () -> ()
    "tpu.trace_start"() <{level = 10 : i32, message = "nlh,nmh->nlm"}> : () -> ()
    %cst_78 = arith.constant dense<0.000000e+00> : vector<4x12x10xf32>
    %92 = tpu.matmul %83, %87, %cst_78 {dimension_numbers = #tpu.dot_dimension_numbers<[2], [2], [1], [1], [0, 0, 0, 1, 1, 1], [0], [0]>} : vector<4x12x8xf32>, vector<4x10x8xf32>, vector<4x12x10xf32> -> vector<4x12x10xf32>
    "tpu.trace_stop"() : () -> ()
    %cst_79 = arith.constant 0.353553385 : f32
    %93 = vector.broadcast %cst_79 : f32 to vector<4x12x10xf32>
    %94 = arith.mulf %92, %93 : vector<4x12x10xf32>
    %95 = vector.shape_cast %5 : vector<1x10xf32> to vector<1x1x10xf32>
    %cst_80 = arith.constant 0.000000e+00 : f32
    %96 = vector.broadcast %cst_80 : f32 to vector<1x1x10xf32>
    %97 = arith.cmpf ogt, %95, %96 : vector<1x1x10xf32>
    %cst_81 = arith.constant -1.000000e+30 : f32
    %98 = vector.shape_cast %97 : vector<1x1x10xi1> to vector<1x1x10xi1>
    %99 = vector.broadcast %98 : vector<1x1x10xi1> to vector<4x12x10xi1>
    %100 = vector.broadcast %cst_81 : f32 to vector<4x12x10xf32>
    %101 = arith.select %99, %94, %100 : vector<4x12x10xi1>, vector<4x12x10xf32>
    %cst_82 = arith.constant dense<0xFF800000> : vector<12x10xf32>
    %102 = vector.multi_reduction <maximumf>, %101, %cst_82 [0] : vector<4x12x10xf32> to vector<12x10xf32>
    %103 = vector.shape_cast %102 : vector<12x10xf32> to vector<1x12x10xf32>
    %104 = vector.broadcast %103 : vector<1x12x10xf32> to vector<4x12x10xf32>
    %105 = arith.subf %101, %104 : vector<4x12x10xf32>
    %106 = math.exp %105 : vector<4x12x10xf32>
    %cst_83 = arith.constant dense<0.000000e+00> : vector<12x10xf32>
    %107 = vector.multi_reduction <add>, %106, %cst_83 [0] : vector<4x12x10xf32> to vector<12x10xf32>
    %108 = vector.shape_cast %107 : vector<12x10xf32> to vector<1x12x10xf32>
    %109 = tpu.reciprocal %108 {approx = true} : vector<1x12x10xf32> -> vector<1x12x10xf32>
    %110 = vector.broadcast %109 : vector<1x12x10xf32> to vector<4x12x10xf32>
    %111 = arith.mulf %106, %110 : vector<4x12x10xf32>
    "tpu.trace_start"() <{level = 10 : i32, message = "nlm,nmh->nlh"}> : () -> ()
    %cst_84 = arith.constant dense<0.000000e+00> : vector<4x12x8xf32>
    %112 = tpu.matmul %111, %91, %cst_84 {dimension_numbers = #tpu.dot_dimension_numbers<[2], [1], [1], [2], [0, 0, 0, 1, 1, 2], [0], [0]>} : vector<4x12x10xf32>, vector<4x10x8xf32>, vector<4x12x8xf32> -> vector<4x12x8xf32>
    "tpu.trace_stop"() : () -> ()
    "tpu.trace_start"() <{level = 10 : i32, message = "nlh,nhd->nld"}> : () -> ()
    %cst_85 = arith.constant dense<0.000000e+00> : vector<4x12x24xf32>
    %113 = tpu.matmul %112, %19, %cst_85 {dimension_numbers = #tpu.dot_dimension_numbers<[2], [1], [1], [2], [0, 0, 0, 1, 1, 2], [0], [0]>} : vector<4x12x8xf32>, vector<4x8x24xf32>, vector<4x12x24xf32> -> vector<4x12x24xf32>
    "tpu.trace_stop"() : () -> ()
    %cst_86 = arith.constant dense<0.000000e+00> : vector<12x24xf32>
    %114 = vector.multi_reduction <add>, %113, %cst_86 [0] : vector<4x12x24xf32> to vector<12x24xf32>
    %c0_87 = arith.constant 0 : index
    %c0_88 = arith.constant 0 : index
    %115 = vector.load %arg16[%c0_87, %c0_88] : memref<48x24xf32, #tpu.memory_space<vmem>>, vector<24x24xf32>
    %cst_89 = arith.constant dense<0.000000e+00> : vector<12x24xf32>
    %116 = tpu.matmul %53, %115, %cst_89 {dimension_numbers = #tpu.dot_dimension_numbers<[1], [0], [0], [1], [0, 0, 1, 1], [], []>} : vector<12x24xf32>, vector<24x24xf32>, vector<12x24xf32> -> vector<12x24xf32>
    %c24 = arith.constant 24 : index
    %c0_90 = arith.constant 0 : index
    %117 = vector.load %arg16[%c24, %c0_90] : memref<48x24xf32, #tpu.memory_space<vmem>>, vector<24x24xf32>
    %cst_91 = arith.constant dense<0.000000e+00> : vector<12x24xf32>
    %118 = tpu.matmul %114, %117, %cst_91 {dimension_numbers = #tpu.dot_dimension_numbers<[1], [0], [0], [1], [0, 0, 1, 1], [], []>} : vector<12x24xf32>, vector<24x24xf32>, vector<12x24xf32> -> vector<12x24xf32>
    %119 = arith.addf %116, %118 : vector<12x24xf32>
    %120 = vector.broadcast %20 : vector<1x24xf32> to vector<12x24xf32>
    %121 = arith.addf %119, %120 : vector<12x24xf32>
    %122 = arith.negf %121 : vector<12x24xf32>
    %123 = math.exp %122 : vector<12x24xf32>
    %cst_92 = arith.constant 1.000000e+00 : f32
    %124 = vector.broadcast %cst_92 : f32 to vector<12x24xf32>
    %125 = arith.addf %124, %123 : vector<12x24xf32>
    %126 = arith.divf %124, %125 : vector<12x24xf32>
    %127 = arith.mulf %126, %53 : vector<12x24xf32>
    %cst_93 = arith.constant 1.000000e+00 : f32
    %128 = vector.broadcast %cst_93 : f32 to vector<12x24xf32>
    %129 = arith.subf %128, %126 : vector<12x24xf32>
    %130 = arith.mulf %129, %114 : vector<12x24xf32>
    %131 = arith.addf %127, %130 : vector<12x24xf32>
    %cst_94 = arith.constant dense<0.000000e+00> : vector<12xf32>
    %132 = vector.multi_reduction <add>, %131, %cst_94 [1] : vector<12x24xf32> to vector<12xf32>
    %133 = vector.shape_cast %132 : vector<12xf32> to vector<12x1xf32>
    %cst_95 = arith.constant 2.400000e+01 : f32
    %134 = vector.broadcast %cst_95 : f32 to vector<12x1xf32>
    %135 = arith.divf %133, %134 : vector<12x1xf32>
    %136 = vector.broadcast %135 : vector<12x1xf32> to vector<12x24xf32>
    %137 = arith.subf %131, %136 : vector<12x24xf32>
    %138 = arith.mulf %137, %137 : vector<12x24xf32>
    %cst_96 = arith.constant dense<0.000000e+00> : vector<12xf32>
    %139 = vector.multi_reduction <add>, %138, %cst_96 [1] : vector<12x24xf32> to vector<12xf32>
    %140 = vector.shape_cast %139 : vector<12xf32> to vector<12x1xf32>
    %cst_97 = arith.constant 2.400000e+01 : f32
    %141 = vector.broadcast %cst_97 : f32 to vector<12x1xf32>
    %142 = arith.divf %140, %141 : vector<12x1xf32>
    %143 = vector.broadcast %135 : vector<12x1xf32> to vector<12x24xf32>
    %144 = arith.subf %131, %143 : vector<12x24xf32>
    %cst_98 = arith.constant 9.99999974E-6 : f32
    %145 = vector.broadcast %cst_98 : f32 to vector<12x1xf32>
    %146 = arith.addf %142, %145 : vector<12x1xf32>
    %147 = math.rsqrt %146 : vector<12x1xf32>
    %148 = vector.broadcast %147 : vector<12x1xf32> to vector<12x24xf32>
    %149 = arith.mulf %144, %148 : vector<12x24xf32>
    %150 = vector.broadcast %21 : vector<1x24xf32> to vector<12x24xf32>
    %151 = arith.mulf %149, %150 : vector<12x24xf32>
    %152 = vector.broadcast %22 : vector<1x24xf32> to vector<12x24xf32>
    %153 = arith.addf %151, %152 : vector<12x24xf32>
    %cst_99 = arith.constant dense<0.000000e+00> : vector<12xf32>
    %154 = vector.multi_reduction <add>, %131, %cst_99 [1] : vector<12x24xf32> to vector<12xf32>
    %155 = vector.shape_cast %154 : vector<12xf32> to vector<12x1xf32>
    %cst_100 = arith.constant 2.400000e+01 : f32
    %156 = vector.broadcast %cst_100 : f32 to vector<12x1xf32>
    %157 = arith.divf %155, %156 : vector<12x1xf32>
    %158 = vector.broadcast %157 : vector<12x1xf32> to vector<12x24xf32>
    %159 = arith.subf %131, %158 : vector<12x24xf32>
    %160 = arith.mulf %159, %159 : vector<12x24xf32>
    %cst_101 = arith.constant dense<0.000000e+00> : vector<12xf32>
    %161 = vector.multi_reduction <add>, %160, %cst_101 [1] : vector<12x24xf32> to vector<12xf32>
    %162 = vector.shape_cast %161 : vector<12xf32> to vector<12x1xf32>
    %cst_102 = arith.constant 2.400000e+01 : f32
    %163 = vector.broadcast %cst_102 : f32 to vector<12x1xf32>
    %164 = arith.divf %162, %163 : vector<12x1xf32>
    %165 = vector.broadcast %157 : vector<12x1xf32> to vector<12x24xf32>
    %166 = arith.subf %131, %165 : vector<12x24xf32>
    %cst_103 = arith.constant 9.99999974E-6 : f32
    %167 = vector.broadcast %cst_103 : f32 to vector<12x1xf32>
    %168 = arith.addf %164, %167 : vector<12x1xf32>
    %169 = math.rsqrt %168 : vector<12x1xf32>
    %170 = vector.broadcast %169 : vector<12x1xf32> to vector<12x24xf32>
    %171 = arith.mulf %166, %170 : vector<12x24xf32>
    %172 = vector.broadcast %23 : vector<1x24xf32> to vector<12x24xf32>
    %173 = arith.mulf %171, %172 : vector<12x24xf32>
    %174 = vector.broadcast %24 : vector<1x24xf32> to vector<12x24xf32>
    %175 = arith.addf %173, %174 : vector<12x24xf32>
    %176 = vector.broadcast %25 : vector<1x24xf32> to vector<12x24xf32>
    %177 = arith.mulf %171, %176 : vector<12x24xf32>
    %178 = vector.broadcast %26 : vector<1x24xf32> to vector<12x24xf32>
    %179 = arith.addf %177, %178 : vector<12x24xf32>
    %180 = vector.shape_cast %153 : vector<12x24xf32> to vector<1x12x24xf32>
    %181 = vector.shape_cast %180 : vector<1x12x24xf32> to vector<1x12x24xf32>
    %182 = vector.broadcast %181 : vector<1x12x24xf32> to vector<4x12x24xf32>
    "tpu.trace_start"() <{level = 10 : i32, message = "nld,ndh->nlh"}> : () -> ()
    %cst_104 = arith.constant dense<0.000000e+00> : vector<4x12x8xf32>
    %183 = tpu.matmul %182, %27, %cst_104 {dimension_numbers = #tpu.dot_dimension_numbers<[2], [1], [1], [2], [0, 0, 0, 1, 1, 2], [0], [0]>} : vector<4x12x24xf32>, vector<4x24x8xf32>, vector<4x12x8xf32> -> vector<4x12x8xf32>
    "tpu.trace_stop"() : () -> ()
    %184 = vector.shape_cast %175 : vector<12x24xf32> to vector<1x12x24xf32>
    %185 = vector.shape_cast %184 : vector<1x12x24xf32> to vector<1x12x24xf32>
    %186 = vector.broadcast %185 : vector<1x12x24xf32> to vector<4x12x24xf32>
    "tpu.trace_start"() <{level = 10 : i32, message = "nmd,ndh->nmh"}> : () -> ()
    %cst_105 = arith.constant dense<0.000000e+00> : vector<4x12x8xf32>
    %187 = tpu.matmul %186, %28, %cst_105 {dimension_numbers = #tpu.dot_dimension_numbers<[2], [1], [1], [2], [0, 0, 0, 1, 1, 2], [0], [0]>} : vector<4x12x24xf32>, vector<4x24x8xf32>, vector<4x12x8xf32> -> vector<4x12x8xf32>
    "tpu.trace_stop"() : () -> ()
    %188 = vector.shape_cast %179 : vector<12x24xf32> to vector<1x12x24xf32>
    %189 = vector.shape_cast %188 : vector<1x12x24xf32> to vector<1x12x24xf32>
    %190 = vector.broadcast %189 : vector<1x12x24xf32> to vector<4x12x24xf32>
    "tpu.trace_start"() <{level = 10 : i32, message = "nmd,ndh->nmh"}> : () -> ()
    %cst_106 = arith.constant dense<0.000000e+00> : vector<4x12x8xf32>
    %191 = tpu.matmul %190, %29, %cst_106 {dimension_numbers = #tpu.dot_dimension_numbers<[2], [1], [1], [2], [0, 0, 0, 1, 1, 2], [0], [0]>} : vector<4x12x24xf32>, vector<4x24x8xf32>, vector<4x12x8xf32> -> vector<4x12x8xf32>
    "tpu.trace_stop"() : () -> ()
    "tpu.trace_start"() <{level = 10 : i32, message = "nlh,nmh->nlm"}> : () -> ()
    %cst_107 = arith.constant dense<0.000000e+00> : vector<4x12x12xf32>
    %192 = tpu.matmul %183, %187, %cst_107 {dimension_numbers = #tpu.dot_dimension_numbers<[2], [2], [1], [1], [0, 0, 0, 1, 1, 1], [0], [0]>} : vector<4x12x8xf32>, vector<4x12x8xf32>, vector<4x12x12xf32> -> vector<4x12x12xf32>
    "tpu.trace_stop"() : () -> ()
    %cst_108 = arith.constant 0.353553385 : f32
    %193 = vector.broadcast %cst_108 : f32 to vector<4x12x12xf32>
    %194 = arith.mulf %192, %193 : vector<4x12x12xf32>
    %195 = vector.shape_cast %7 : vector<1x12xf32> to vector<1x1x12xf32>
    %cst_109 = arith.constant 0.000000e+00 : f32
    %196 = vector.broadcast %cst_109 : f32 to vector<1x1x12xf32>
    %197 = arith.cmpf ogt, %195, %196 : vector<1x1x12xf32>
    %cst_110 = arith.constant -1.000000e+30 : f32
    %198 = vector.shape_cast %197 : vector<1x1x12xi1> to vector<1x1x12xi1>
    %199 = vector.broadcast %198 : vector<1x1x12xi1> to vector<4x12x12xi1>
    %200 = vector.broadcast %cst_110 : f32 to vector<4x12x12xf32>
    %201 = arith.select %199, %194, %200 : vector<4x12x12xi1>, vector<4x12x12xf32>
    %cst_111 = arith.constant dense<0xFF800000> : vector<12x12xf32>
    %202 = vector.multi_reduction <maximumf>, %201, %cst_111 [0] : vector<4x12x12xf32> to vector<12x12xf32>
    %203 = vector.shape_cast %202 : vector<12x12xf32> to vector<1x12x12xf32>
    %204 = vector.broadcast %203 : vector<1x12x12xf32> to vector<4x12x12xf32>
    %205 = arith.subf %201, %204 : vector<4x12x12xf32>
    %206 = math.exp %205 : vector<4x12x12xf32>
    %cst_112 = arith.constant dense<0.000000e+00> : vector<12x12xf32>
    %207 = vector.multi_reduction <add>, %206, %cst_112 [0] : vector<4x12x12xf32> to vector<12x12xf32>
    %208 = vector.shape_cast %207 : vector<12x12xf32> to vector<1x12x12xf32>
    %209 = tpu.reciprocal %208 {approx = true} : vector<1x12x12xf32> -> vector<1x12x12xf32>
    %210 = vector.broadcast %209 : vector<1x12x12xf32> to vector<4x12x12xf32>
    %211 = arith.mulf %206, %210 : vector<4x12x12xf32>
    "tpu.trace_start"() <{level = 10 : i32, message = "nlm,nmh->nlh"}> : () -> ()
    %cst_113 = arith.constant dense<0.000000e+00> : vector<4x12x8xf32>
    %212 = tpu.matmul %211, %191, %cst_113 {dimension_numbers = #tpu.dot_dimension_numbers<[2], [1], [1], [2], [0, 0, 0, 1, 1, 2], [0], [0]>} : vector<4x12x12xf32>, vector<4x12x8xf32>, vector<4x12x8xf32> -> vector<4x12x8xf32>
    "tpu.trace_stop"() : () -> ()
    "tpu.trace_start"() <{level = 10 : i32, message = "nlh,nhd->nld"}> : () -> ()
    %cst_114 = arith.constant dense<0.000000e+00> : vector<4x12x24xf32>
    %213 = tpu.matmul %212, %30, %cst_114 {dimension_numbers = #tpu.dot_dimension_numbers<[2], [1], [1], [2], [0, 0, 0, 1, 1, 2], [0], [0]>} : vector<4x12x8xf32>, vector<4x8x24xf32>, vector<4x12x24xf32> -> vector<4x12x24xf32>
    "tpu.trace_stop"() : () -> ()
    %cst_115 = arith.constant dense<0.000000e+00> : vector<12x24xf32>
    %214 = vector.multi_reduction <add>, %213, %cst_115 [0] : vector<4x12x24xf32> to vector<12x24xf32>
    %c0_116 = arith.constant 0 : index
    %c0_117 = arith.constant 0 : index
    %215 = vector.load %arg28[%c0_116, %c0_117] : memref<48x24xf32, #tpu.memory_space<vmem>>, vector<24x24xf32>
    %cst_118 = arith.constant dense<0.000000e+00> : vector<12x24xf32>
    %216 = tpu.matmul %153, %215, %cst_118 {dimension_numbers = #tpu.dot_dimension_numbers<[1], [0], [0], [1], [0, 0, 1, 1], [], []>} : vector<12x24xf32>, vector<24x24xf32>, vector<12x24xf32> -> vector<12x24xf32>
    %c24_119 = arith.constant 24 : index
    %c0_120 = arith.constant 0 : index
    %217 = vector.load %arg28[%c24_119, %c0_120] : memref<48x24xf32, #tpu.memory_space<vmem>>, vector<24x24xf32>
    %cst_121 = arith.constant dense<0.000000e+00> : vector<12x24xf32>
    %218 = tpu.matmul %214, %217, %cst_121 {dimension_numbers = #tpu.dot_dimension_numbers<[1], [0], [0], [1], [0, 0, 1, 1], [], []>} : vector<12x24xf32>, vector<24x24xf32>, vector<12x24xf32> -> vector<12x24xf32>
    %219 = arith.addf %216, %218 : vector<12x24xf32>
    %220 = vector.broadcast %31 : vector<1x24xf32> to vector<12x24xf32>
    %221 = arith.addf %219, %220 : vector<12x24xf32>
    %222 = arith.negf %221 : vector<12x24xf32>
    %223 = math.exp %222 : vector<12x24xf32>
    %cst_122 = arith.constant 1.000000e+00 : f32
    %224 = vector.broadcast %cst_122 : f32 to vector<12x24xf32>
    %225 = arith.addf %224, %223 : vector<12x24xf32>
    %226 = arith.divf %224, %225 : vector<12x24xf32>
    %227 = arith.mulf %226, %153 : vector<12x24xf32>
    %cst_123 = arith.constant 1.000000e+00 : f32
    %228 = vector.broadcast %cst_123 : f32 to vector<12x24xf32>
    %229 = arith.subf %228, %226 : vector<12x24xf32>
    %230 = arith.mulf %229, %214 : vector<12x24xf32>
    %231 = arith.addf %227, %230 : vector<12x24xf32>
    %cst_124 = arith.constant dense<0.000000e+00> : vector<16xf32>
    %232 = vector.multi_reduction <add>, %1, %cst_124 [0] : vector<10x16xf32> to vector<16xf32>
    %233 = vector.shape_cast %232 : vector<16xf32> to vector<1x16xf32>
    %c0_125 = arith.constant 0 : index
    %c0_126 = arith.constant 0 : index
    %234 = vector.load %arg30[%c0_125, %c0_126] : memref<16x32xf32, #tpu.memory_space<vmem>>, vector<16x32xf32>
    %cst_127 = arith.constant dense<0.000000e+00> : vector<1x32xf32>
    %235 = tpu.matmul %233, %234, %cst_127 {dimension_numbers = #tpu.dot_dimension_numbers<[1], [0], [0], [1], [0, 0, 1, 1], [], []>} : vector<1x16xf32>, vector<16x32xf32>, vector<1x32xf32> -> vector<1x32xf32>
    %c0_128 = arith.constant 0 : index
    %c0_129 = arith.constant 0 : index
    %236 = vector.load %arg31[%c0_128, %c0_129] : memref<1x32xf32, #tpu.memory_space<vmem>>, vector<1x32xf32>
    %237 = arith.addf %235, %236 : vector<1x32xf32>
    %c0_130 = arith.constant 0 : index
    %c0_131 = arith.constant 0 : index
    %238 = vector.load %arg32[%c0_130, %c0_131] : memref<24x32xf32, #tpu.memory_space<vmem>>, vector<24x32xf32>
    %cst_132 = arith.constant dense<0.000000e+00> : vector<12x32xf32>
    %239 = tpu.matmul %231, %238, %cst_132 {dimension_numbers = #tpu.dot_dimension_numbers<[1], [0], [0], [1], [0, 0, 1, 1], [], []>} : vector<12x24xf32>, vector<24x32xf32>, vector<12x32xf32> -> vector<12x32xf32>
    %c0_133 = arith.constant 0 : index
    %c0_134 = arith.constant 0 : index
    %240 = vector.load %arg33[%c0_133, %c0_134] : memref<1x32xf32, #tpu.memory_space<vmem>>, vector<1x32xf32>
    %241 = vector.broadcast %240 : vector<1x32xf32> to vector<12x32xf32>
    %242 = arith.addf %239, %241 : vector<12x32xf32>
    %cst_135 = arith.constant dense<0.000000e+00> : vector<32xf32>
    %243 = vector.multi_reduction <add>, %242, %cst_135 [0] : vector<12x32xf32> to vector<32xf32>
    %244 = vector.shape_cast %243 : vector<32xf32> to vector<1x32xf32>
    %c0_136 = arith.constant 0 : index
    %c0_137 = arith.constant 0 : index
    %245 = vector.load %arg34[%c0_136, %c0_137] : memref<132x32xf32, #tpu.memory_space<vmem>>, vector<32x32xf32>
    %cst_138 = arith.constant dense<0.000000e+00> : vector<1x32xf32>
    %246 = tpu.matmul %237, %245, %cst_138 {dimension_numbers = #tpu.dot_dimension_numbers<[1], [0], [0], [1], [0, 0, 1, 1], [], []>} : vector<1x32xf32>, vector<32x32xf32>, vector<1x32xf32> -> vector<1x32xf32>
    %c32 = arith.constant 32 : index
    %c0_139 = arith.constant 0 : index
    %247 = vector.load %arg34[%c32, %c0_139] : memref<132x32xf32, #tpu.memory_space<vmem>>, vector<32x32xf32>
    %cst_140 = arith.constant dense<0.000000e+00> : vector<1x32xf32>
    %248 = tpu.matmul %244, %247, %cst_140 {dimension_numbers = #tpu.dot_dimension_numbers<[1], [0], [0], [1], [0, 0, 1, 1], [], []>} : vector<1x32xf32>, vector<32x32xf32>, vector<1x32xf32> -> vector<1x32xf32>
    %249 = arith.addf %246, %248 : vector<1x32xf32>
    %250 = arith.subf %244, %237 : vector<1x32xf32>
    %c64 = arith.constant 64 : index
    %c0_141 = arith.constant 0 : index
    %251 = vector.load %arg34[%c64, %c0_141] : memref<132x32xf32, #tpu.memory_space<vmem>>, vector<32x32xf32>
    %cst_142 = arith.constant dense<0.000000e+00> : vector<1x32xf32>
    %252 = tpu.matmul %250, %251, %cst_142 {dimension_numbers = #tpu.dot_dimension_numbers<[1], [0], [0], [1], [0, 0, 1, 1], [], []>} : vector<1x32xf32>, vector<32x32xf32>, vector<1x32xf32> -> vector<1x32xf32>
    %253 = arith.addf %249, %252 : vector<1x32xf32>
    %254 = arith.mulf %244, %237 : vector<1x32xf32>
    %c96 = arith.constant 96 : index
    %c0_143 = arith.constant 0 : index
    %255 = vector.load %arg34[%c96, %c0_143] : memref<132x32xf32, #tpu.memory_space<vmem>>, vector<32x32xf32>
    %cst_144 = arith.constant dense<0.000000e+00> : vector<1x32xf32>
    %256 = tpu.matmul %254, %255, %cst_144 {dimension_numbers = #tpu.dot_dimension_numbers<[1], [0], [0], [1], [0, 0, 1, 1], [], []>} : vector<1x32xf32>, vector<32x32xf32>, vector<1x32xf32> -> vector<1x32xf32>
    %257 = arith.addf %253, %256 : vector<1x32xf32>
    %c128 = arith.constant 128 : index
    %c0_145 = arith.constant 0 : index
    %258 = vector.load %arg34[%c128, %c0_145] : memref<132x32xf32, #tpu.memory_space<vmem>>, vector<4x32xf32>
    %cst_146 = arith.constant dense<0.000000e+00> : vector<1x32xf32>
    %259 = tpu.matmul %9, %258, %cst_146 {dimension_numbers = #tpu.dot_dimension_numbers<[1], [0], [0], [1], [0, 0, 1, 1], [], []>} : vector<1x4xf32>, vector<4x32xf32>, vector<1x32xf32> -> vector<1x32xf32>
    %260 = arith.addf %257, %259 : vector<1x32xf32>
    %c0_147 = arith.constant 0 : index
    %c0_148 = arith.constant 0 : index
    %261 = vector.load %arg35[%c0_147, %c0_148] : memref<1x32xf32, #tpu.memory_space<vmem>>, vector<1x32xf32>
    %262 = arith.addf %260, %261 : vector<1x32xf32>
    %cst_149 = arith.constant 0.000000e+00 : f32
    %263 = vector.broadcast %cst_149 : f32 to vector<1x32xf32>
    %264 = arith.maximumf %262, %263 : vector<1x32xf32>
    %c0_150 = arith.constant 0 : index
    %c0_151 = arith.constant 0 : index
    %265 = vector.load %arg36[%c0_150, %c0_151] : memref<36x1xf32, #tpu.memory_space<vmem>>, vector<32x1xf32>
    %cst_152 = arith.constant dense<0.000000e+00> : vector<1x1xf32>
    %266 = tpu.matmul %264, %265, %cst_152 {dimension_numbers = #tpu.dot_dimension_numbers<[1], [0], [0], [1], [0, 0, 1, 1], [], []>} : vector<1x32xf32>, vector<32x1xf32>, vector<1x1xf32> -> vector<1x1xf32>
    %c32_153 = arith.constant 32 : index
    %c0_154 = arith.constant 0 : index
    %267 = vector.load %arg36[%c32_153, %c0_154] : memref<36x1xf32, #tpu.memory_space<vmem>>, vector<4x1xf32>
    %cst_155 = arith.constant dense<0.000000e+00> : vector<1x1xf32>
    %268 = tpu.matmul %9, %267, %cst_155 {dimension_numbers = #tpu.dot_dimension_numbers<[1], [0], [0], [1], [0, 0, 1, 1], [], []>} : vector<1x4xf32>, vector<4x1xf32>, vector<1x1xf32> -> vector<1x1xf32>
    %269 = arith.addf %266, %268 : vector<1x1xf32>
    %c0_156 = arith.constant 0 : index
    %c0_157 = arith.constant 0 : index
    %270 = vector.load %arg37[%c0_156, %c0_157] : memref<1x1xf32, #tpu.memory_space<vmem>>, vector<1x1xf32>
    %271 = arith.addf %269, %270 : vector<1x1xf32>
    %272 = vector.shape_cast %271 : vector<1x1xf32> to vector<1x1xf32>
    %273 = vector.broadcast %272 : vector<1x1xf32> to vector<1x128xf32>
    %c0_158 = arith.constant 0 : index
    %c0_159 = arith.constant 0 : index
    %c0_160 = arith.constant 0 : index
    %274 = vector.load %arg38[%c0_158, %c0_159, %c0_160] : memref<1x1x128xf32, #tpu.memory_space<vmem>>, vector<1x1x128xf32>
    %275 = vector.shape_cast %274 : vector<1x1x128xf32> to vector<1x128xf32>
    %276 = vector.shape_cast %273 : vector<1x128xf32> to vector<1x1x128xf32>
    tpu.vector_store %arg38[%c0_158, %c0_159, %c0_160], %276 {strides = array<i32>} : memref<1x1x128xf32, #tpu.memory_space<vmem>>, vector<1x1x128xf32>,
    return
  }
  func.func @transform_0(%arg0: i32) -> (i32, i32, i32) {
    %c0_i32 = arith.constant 0 : i32
    %c0_i32_0 = arith.constant 0 : i32
    %c0_i32_1 = arith.constant 0 : i32
    return %arg0, %c0_i32, %c0_i32_0 : i32, i32, i32
  }
  func.func @transform_1(%arg0: i32) -> (i32, i32, i32) {
    %c0_i32 = arith.constant 0 : i32
    %c0_i32_0 = arith.constant 0 : i32
    %c0_i32_1 = arith.constant 0 : i32
    return %arg0, %c0_i32, %c0_i32_0 : i32, i32, i32
  }
  func.func @transform_2(%arg0: i32) -> (i32, i32, i32) {
    %c0_i32 = arith.constant 0 : i32
    %c0_i32_0 = arith.constant 0 : i32
    %c0_i32_1 = arith.constant 0 : i32
    return %arg0, %c0_i32, %c0_i32_0 : i32, i32, i32
  }
  func.func @transform_3(%arg0: i32) -> (i32, i32, i32) {
    %c0_i32 = arith.constant 0 : i32
    %c0_i32_0 = arith.constant 0 : i32
    %c0_i32_1 = arith.constant 0 : i32
    return %arg0, %c0_i32, %c0_i32_0 : i32, i32, i32
  }
  func.func @transform_4(%arg0: i32) -> (i32, i32, i32) {
    %c0_i32 = arith.constant 0 : i32
    %c0_i32_0 = arith.constant 0 : i32
    %c0_i32_1 = arith.constant 0 : i32
    return %arg0, %c0_i32, %c0_i32_0 : i32, i32, i32
  }
  func.func @transform_5(%arg0: i32) -> (i32, i32) {
    %c0_i32 = arith.constant 0 : i32
    %c0_i32_0 = arith.constant 0 : i32
    %c0_i32_1 = arith.constant 0 : i32
    return %c0_i32, %c0_i32_0 : i32, i32
  }
  func.func @transform_6(%arg0: i32) -> (i32, i32) {
    %c0_i32 = arith.constant 0 : i32
    %c0_i32_0 = arith.constant 0 : i32
    %c0_i32_1 = arith.constant 0 : i32
    return %c0_i32, %c0_i32_0 : i32, i32
  }
  func.func @transform_7(%arg0: i32) -> (i32, i32) {
    %c0_i32 = arith.constant 0 : i32
    %c0_i32_0 = arith.constant 0 : i32
    %c0_i32_1 = arith.constant 0 : i32
    return %c0_i32, %c0_i32_0 : i32, i32
  }
  func.func @transform_8(%arg0: i32) -> (i32, i32) {
    %c0_i32 = arith.constant 0 : i32
    %c0_i32_0 = arith.constant 0 : i32
    %c0_i32_1 = arith.constant 0 : i32
    return %c0_i32, %c0_i32_0 : i32, i32
  }
  func.func @transform_9(%arg0: i32) -> (i32, i32) {
    %c0_i32 = arith.constant 0 : i32
    %c0_i32_0 = arith.constant 0 : i32
    %c0_i32_1 = arith.constant 0 : i32
    return %c0_i32, %c0_i32_0 : i32, i32
  }
  func.func @transform_10(%arg0: i32) -> (i32, i32) {
    %c0_i32 = arith.constant 0 : i32
    %c0_i32_0 = arith.constant 0 : i32
    %c0_i32_1 = arith.constant 0 : i32
    return %c0_i32, %c0_i32_0 : i32, i32
  }
  func.func @transform_11(%arg0: i32) -> (i32, i32, i32) {
    %c0_i32 = arith.constant 0 : i32
    %c0_i32_0 = arith.constant 0 : i32
    %c0_i32_1 = arith.constant 0 : i32
    %c0_i32_2 = arith.constant 0 : i32
    return %c0_i32, %c0_i32_0, %c0_i32_1 : i32, i32, i32
  }
  func.func @transform_12(%arg0: i32) -> (i32, i32, i32) {
    %c0_i32 = arith.constant 0 : i32
    %c0_i32_0 = arith.constant 0 : i32
    %c0_i32_1 = arith.constant 0 : i32
    %c0_i32_2 = arith.constant 0 : i32
    return %c0_i32, %c0_i32_0, %c0_i32_1 : i32, i32, i32
  }
  func.func @transform_13(%arg0: i32) -> (i32, i32, i32) {
    %c0_i32 = arith.constant 0 : i32
    %c0_i32_0 = arith.constant 0 : i32
    %c0_i32_1 = arith.constant 0 : i32
    %c0_i32_2 = arith.constant 0 : i32
    return %c0_i32, %c0_i32_0, %c0_i32_1 : i32, i32, i32
  }
  func.func @transform_14(%arg0: i32) -> (i32, i32, i32) {
    %c0_i32 = arith.constant 0 : i32
    %c0_i32_0 = arith.constant 0 : i32
    %c0_i32_1 = arith.constant 0 : i32
    %c0_i32_2 = arith.constant 0 : i32
    return %c0_i32, %c0_i32_0, %c0_i32_1 : i32, i32, i32
  }
  func.func @transform_15(%arg0: i32) -> (i32, i32) {
    %c0_i32 = arith.constant 0 : i32
    %c0_i32_0 = arith.constant 0 : i32
    %c0_i32_1 = arith.constant 0 : i32
    return %c0_i32, %c0_i32_0 : i32, i32
  }
  func.func @transform_16(%arg0: i32) -> (i32, i32) {
    %c0_i32 = arith.constant 0 : i32
    %c0_i32_0 = arith.constant 0 : i32
    %c0_i32_1 = arith.constant 0 : i32
    return %c0_i32, %c0_i32_0 : i32, i32
  }
  func.func @transform_17(%arg0: i32) -> (i32, i32) {
    %c0_i32 = arith.constant 0 : i32
    %c0_i32_0 = arith.constant 0 : i32
    %c0_i32_1 = arith.constant 0 : i32
    return %c0_i32, %c0_i32_0 : i32, i32
  }
  func.func @transform_18(%arg0: i32) -> (i32, i32) {
    %c0_i32 = arith.constant 0 : i32
    %c0_i32_0 = arith.constant 0 : i32
    %c0_i32_1 = arith.constant 0 : i32
    return %c0_i32, %c0_i32_0 : i32, i32
  }
  func.func @transform_19(%arg0: i32) -> (i32, i32) {
    %c0_i32 = arith.constant 0 : i32
    %c0_i32_0 = arith.constant 0 : i32
    %c0_i32_1 = arith.constant 0 : i32
    return %c0_i32, %c0_i32_0 : i32, i32
  }
  func.func @transform_20(%arg0: i32) -> (i32, i32) {
    %c0_i32 = arith.constant 0 : i32
    %c0_i32_0 = arith.constant 0 : i32
    %c0_i32_1 = arith.constant 0 : i32
    return %c0_i32, %c0_i32_0 : i32, i32
  }
  func.func @transform_21(%arg0: i32) -> (i32, i32) {
    %c0_i32 = arith.constant 0 : i32
    %c0_i32_0 = arith.constant 0 : i32
    %c0_i32_1 = arith.constant 0 : i32
    return %c0_i32, %c0_i32_0 : i32, i32
  }
  func.func @transform_22(%arg0: i32) -> (i32, i32) {
    %c0_i32 = arith.constant 0 : i32
    %c0_i32_0 = arith.constant 0 : i32
    %c0_i32_1 = arith.constant 0 : i32
    return %c0_i32, %c0_i32_0 : i32, i32
  }
  func.func @transform_23(%arg0: i32) -> (i32, i32, i32) {
    %c0_i32 = arith.constant 0 : i32
    %c0_i32_0 = arith.constant 0 : i32
    %c0_i32_1 = arith.constant 0 : i32
    %c0_i32_2 = arith.constant 0 : i32
    return %c0_i32, %c0_i32_0, %c0_i32_1 : i32, i32, i32
  }
  func.func @transform_24(%arg0: i32) -> (i32, i32, i32) {
    %c0_i32 = arith.constant 0 : i32
    %c0_i32_0 = arith.constant 0 : i32
    %c0_i32_1 = arith.constant 0 : i32
    %c0_i32_2 = arith.constant 0 : i32
    return %c0_i32, %c0_i32_0, %c0_i32_1 : i32, i32, i32
  }
  func.func @transform_25(%arg0: i32) -> (i32, i32, i32) {
    %c0_i32 = arith.constant 0 : i32
    %c0_i32_0 = arith.constant 0 : i32
    %c0_i32_1 = arith.constant 0 : i32
    %c0_i32_2 = arith.constant 0 : i32
    return %c0_i32, %c0_i32_0, %c0_i32_1 : i32, i32, i32
  }
  func.func @transform_26(%arg0: i32) -> (i32, i32, i32) {
    %c0_i32 = arith.constant 0 : i32
    %c0_i32_0 = arith.constant 0 : i32
    %c0_i32_1 = arith.constant 0 : i32
    %c0_i32_2 = arith.constant 0 : i32
    return %c0_i32, %c0_i32_0, %c0_i32_1 : i32, i32, i32
  }
  func.func @transform_27(%arg0: i32) -> (i32, i32) {
    %c0_i32 = arith.constant 0 : i32
    %c0_i32_0 = arith.constant 0 : i32
    %c0_i32_1 = arith.constant 0 : i32
    return %c0_i32, %c0_i32_0 : i32, i32
  }
  func.func @transform_28(%arg0: i32) -> (i32, i32) {
    %c0_i32 = arith.constant 0 : i32
    %c0_i32_0 = arith.constant 0 : i32
    %c0_i32_1 = arith.constant 0 : i32
    return %c0_i32, %c0_i32_0 : i32, i32
  }
  func.func @transform_29(%arg0: i32) -> (i32, i32) {
    %c0_i32 = arith.constant 0 : i32
    %c0_i32_0 = arith.constant 0 : i32
    %c0_i32_1 = arith.constant 0 : i32
    return %c0_i32, %c0_i32_0 : i32, i32
  }
  func.func @transform_30(%arg0: i32) -> (i32, i32) {
    %c0_i32 = arith.constant 0 : i32
    %c0_i32_0 = arith.constant 0 : i32
    %c0_i32_1 = arith.constant 0 : i32
    return %c0_i32, %c0_i32_0 : i32, i32
  }
  func.func @transform_31(%arg0: i32) -> (i32, i32) {
    %c0_i32 = arith.constant 0 : i32
    %c0_i32_0 = arith.constant 0 : i32
    %c0_i32_1 = arith.constant 0 : i32
    return %c0_i32, %c0_i32_0 : i32, i32
  }
  func.func @transform_32(%arg0: i32) -> (i32, i32) {
    %c0_i32 = arith.constant 0 : i32
    %c0_i32_0 = arith.constant 0 : i32
    %c0_i32_1 = arith.constant 0 : i32
    return %c0_i32, %c0_i32_0 : i32, i32
  }
  func.func @transform_33(%arg0: i32) -> (i32, i32) {
    %c0_i32 = arith.constant 0 : i32
    %c0_i32_0 = arith.constant 0 : i32
    %c0_i32_1 = arith.constant 0 : i32
    return %c0_i32, %c0_i32_0 : i32, i32
  }
  func.func @transform_34(%arg0: i32) -> (i32, i32) {
    %c0_i32 = arith.constant 0 : i32
    %c0_i32_0 = arith.constant 0 : i32
    %c0_i32_1 = arith.constant 0 : i32
    return %c0_i32, %c0_i32_0 : i32, i32
  }
  func.func @transform_35(%arg0: i32) -> (i32, i32) {
    %c0_i32 = arith.constant 0 : i32
    %c0_i32_0 = arith.constant 0 : i32
    %c0_i32_1 = arith.constant 0 : i32
    return %c0_i32, %c0_i32_0 : i32, i32
  }
  func.func @transform_36(%arg0: i32) -> (i32, i32) {
    %c0_i32 = arith.constant 0 : i32
    %c0_i32_0 = arith.constant 0 : i32
    %c0_i32_1 = arith.constant 0 : i32
    return %c0_i32, %c0_i32_0 : i32, i32
  }
  func.func @transform_37(%arg0: i32) -> (i32, i32, i32) {
    %c0_i32 = arith.constant 0 : i32
    %c0_i32_0 = arith.constant 0 : i32
    %c0_i32_1 = arith.constant 0 : i32
    return %arg0, %c0_i32, %c0_i32_0 : i32, i32, i32
  }
}

</mosaic_0001>

<bundles_post_ra>
// kernel: sum_attn_predict_forward.1
= control target key start
LH: loop header
LB: loop body
LE: loop exit
PB: predicated region body
PF: predicated region fallthrough
CT: control target
= control target key end

     0   :  { %s7781_s6 = smov 1   ;;  %s7782_s10 = smov 2   ;;  %s8550_s0 = inlined_call_operand.smem [shape: u32[38], index: -1, kind: input, shape index: {}] }
   0x1   :  { %s7829_s5 = sld [smem:[%s8550_s0]]   ;;  %s7783_s14 = smov 3  }
   0x2   :  { %s7834_s9 = sld [smem:[%s8550_s0 + %s7781_s6]]   ;;  %s7784_s18 = smov 4  }
   0x3   :  { %s7839_s13 = sld [smem:[%s8550_s0 + %s7782_s10]]   ;;  %s7785_s22 = smov 5  }
   0x4   :  { %s7844_s17 = sld [smem:[%s8550_s0 + %s7783_s14]]   ;;  %s7786_s26 = smov 6  }
   0x5   :  { %s7849_s21 = sld [smem:[%s8550_s0 + %s7784_s18]]   ;;  %s7787_s30 = smov 7  }
   0x6   :  { %s7854_s25 = sld [smem:[%s8550_s0 + %s7785_s22]]   ;;  %s7788_s4 = smov 8  }
   0x7   :  { %s7859_s29 = sld [smem:[%s8550_s0 + %s7786_s26]]   ;;  %s7789_s10 = smov 9  }
   0x8   :  { %s7864_s3 = sld [smem:[%s8550_s0 + %s7787_s30]]   ;;  %s7790_s15 = smov 10  }
   0x9   :  { %s7869_s8 = sld [smem:[%s8550_s0 + %s7788_s4]]   ;;  %s7791_s20 = smov 11  }
   0xa   :  { %8559 = sst [smem:[#allocation3_spill]] %s7844_s17  ;;  %s7792_s26 = smov 12  }
   0xb   :  { %8560 = sst [smem:[#allocation4_spill]] %s7849_s21  ;;  %s7793_s1 = smov 13  }
   0xc   :  { %s7874_s14 = sld [smem:[%s8550_s0 + %s7789_s10]]   ;;  %s7794_s7 = smov 14  }
   0xd   :  { %s7879_s19 = sld [smem:[%s8550_s0 + %s7790_s15]]   ;;  %s7795_s15 = smov 15  }
   0xe   :  { %s7884_s24 = sld [smem:[%s8550_s0 + %s7791_s20]]   ;;  %s7796_s22 = smov 16  }
   0xf   :  { %s7889_s30 = sld [smem:[%s8550_s0 + %s7792_s26]]   ;;  %s7797_s28 = smov 17  }
  0x10   :  { %s7894_s6 = sld [smem:[%s8550_s0 + %s7793_s1]]   ;;  %s7817_s1 = smov 37  }
  0x11   :  { %s7899_s12 = sld [smem:[%s8550_s0 + %s7794_s7]]   ;;  %s7798_s7 = smov 18  }
  0x12   :  { %s7904_s20 = sld [smem:[%s8550_s0 + %s7795_s15]]   ;;  %s7799_s15 = smov 19  }
  0x13   :  { %s7909_s27 = sld [smem:[%s8550_s0 + %s7796_s22]]   ;;  %s7800_s22 = smov 20  }
  0x14   :  { %s7914_s4 = sld [smem:[%s8550_s0 + %s7797_s28]]   ;;  %s7801_s28 = smov 21  }
  0x15   :  { %s7919_s21 = sld [smem:[%s8550_s0 + %s7798_s7]]   ;;  %s7802_s7 = smov 22  }
  0x16   :  { %s7924_s17 = sld [smem:[%s8550_s0 + %s7799_s15]]   ;;  %s7803_s15 = smov 23  }
  0x19   :  { %8561 = sst [smem:[#allocation5_spill]] %s7909_s27 }
  0x1a   :  { %8562 = sst [smem:[#allocation6_spill]] %s7914_s4 }
  0x1b   :  { %8563 = sst [smem:[#allocation7_spill]] %s7919_s21 }
  0x1c   :  { %8564 = sst [smem:[#allocation8_spill]] %s7924_s17 }
  0x1d   :  { %s7929_s27 = sld [smem:[%s8550_s0 + %s7800_s22]]   ;;  %s7804_s22 = smov 24  }
  0x1e   :  { %s7934_s4 = sld [smem:[%s8550_s0 + %s7801_s28]]   ;;  %s7805_s28 = smov 25  }
  0x1f   :  { %s7939_s21 = sld [smem:[%s8550_s0 + %s7802_s7]]   ;;  %s7806_s7 = smov 26  }
  0x20   :  { %s7944_s17 = sld [smem:[%s8550_s0 + %s7803_s15]]   ;;  %s7807_s15 = smov 27  }
  0x23   :  { %8565 = sst [smem:[#allocation9_spill]] %s7929_s27 }
  0x24   :  { %8566 = sst [smem:[#allocation10_spill]] %s7934_s4 }
  0x25   :  { %8567 = sst [smem:[#allocation11_spill]] %s7939_s21 }
  0x26   :  { %8568 = sst [smem:[#allocation12_spill]] %s7944_s17 }
  0x27   :  { %s7949_s27 = sld [smem:[%s8550_s0 + %s7804_s22]]   ;;  %s7808_s22 = smov 28  }
  0x28   :  { %s7954_s4 = sld [smem:[%s8550_s0 + %s7805_s28]]   ;;  %s7809_s28 = smov 29  }
  0x29   :  { %s7959_s21 = sld [smem:[%s8550_s0 + %s7806_s7]]   ;;  %s7810_s7 = smov 30  }
  0x2a   :  { %s7964_s17 = sld [smem:[%s8550_s0 + %s7807_s15]]   ;;  %s7811_s15 = smov 31  }
  0x2d   :  { %8569 = sst [smem:[#allocation13_spill]] %s7949_s27 }
  0x2e   :  { %8570 = sst [smem:[#allocation14_spill]] %s7954_s4 }
  0x2f   :  { %8571 = sst [smem:[#allocation15_spill]] %s7959_s21 }
  0x30   :  { %8572 = sst [smem:[#allocation16_spill]] %s7964_s17 }
  0x31   :  { %s7969_s27 = sld [smem:[%s8550_s0 + %s7808_s22]]   ;;  %s7812_s22 = smov 32  }
  0x32   :  { %s7974_s4 = sld [smem:[%s8550_s0 + %s7809_s28]]   ;;  %s7813_s28 = smov 33  }
  0x33   :  { %s7979_s21 = sld [smem:[%s8550_s0 + %s7810_s7]]   ;;  %s7814_s7 = smov 34  }
  0x34   :  { %s7984_s17 = sld [smem:[%s8550_s0 + %s7811_s15]]   ;;  %s7815_s15 = smov 35  }
  0x37   :  { %8573 = sst [smem:[#allocation17_spill]] %s7969_s27 }
  0x38   :  { %8574 = sst [smem:[#allocation18_spill]] %s7974_s4 }
  0x39   :  { %8575 = sst [smem:[#allocation19_spill]] %s7979_s21 }
  0x3a   :  { %8576 = sst [smem:[#allocation20_spill]] %s7984_s17 }
  0x3b   :  { %s7989_s27 = sld [smem:[%s8550_s0 + %s7812_s22]]   ;;  %s7816_s22 = smov 36  }
  0x3c   :  { %s7994_s4 = sld [smem:[%s8550_s0 + %s7813_s28]]  }
  0x3d   :  { %s7999_s21 = sld [smem:[%s8550_s0 + %s7814_s7]]   ;;  %s8014_s7 = smov 0  }
  0x3e   :  { %s8004_s17 = sld [smem:[%s8550_s0 + %s7815_s15]]  }
  0x41   :  { %8577 = sst [smem:[#allocation21_spill]] %s7989_s27 }
  0x42   :  { %8578 = sst [smem:[#allocation22_spill]] %s7994_s4 }
  0x43   :  { %s6756_s27 = sld [smem:[%s8550_s0 + %s7816_s22]]  }
  0x44   :  { %s8012_s4 = sld [smem:[%s8550_s0 + %s7817_s1]]  }
  0x49   :  { %v80_v0 = vstv %s6756_s27 }
  0x4a   :  { %81 = vst [vmem:[#allocation2] sm:$0x1] %v80_v0 }
  0x4b LB: > { %s6758_s10 = sadd.s32 4294967295, %s7779_s7   ;;  %p6762_p0 = scmp.ge.s32.totalorder %s7779_s7, 1  ;;  %s7779_s7 = sphi %s8014_s7, %s87_s7  }
  0x4c   : > { %p1061_p1 = scmp.lt.s32.totalorder %s7779_s7, 3 }
  0x4e   : > { %p1062_p2 = pnand %p6762_p0, %p1061_p1 }
  0x4f   : > { %p1165_p3 = scmp.lt.s32.totalorder (!%p1062_p2), %s6758_s10, 1  ;;  %s8579_s16 = sld [smem:[#allocation5_spill]] (!%p1062_p2) }
  0x50   : > { %1065 = sbr.rel (%p1062_p2) target bundleno = 3684 (0xe64), region = 168  ;;  %s8580_s18 = sld [smem:[#allocation12_spill]] (!%p1062_p2) }
  0x51   : > { %s8581_s22 = sld [smem:[#allocation6_spill]] (!%p1062_p2) }
  0x52   : > { %s8582_s23 = sld [smem:[#allocation7_spill]] (!%p1062_p2) }
  0x53   : > { %s8583_s26 = sld [smem:[#allocation8_spill]] (!%p1062_p2) }
  0x54   : > { %s8584_s1 = sld [smem:[#allocation13_spill]] (!%p1062_p2) }
  0x55   : > { %s8600_s10 = smov (!%p1165_p3, %s6758_s10), 1  ;;  %vm1280_vm0 = vcmask 195584   ;;  %vm1325_vm1 = vcmask 130048   ;;  %vm1329_vm2 = vcmask 123904   ;;  %vm1284_vm3 = vcmask 191488   ;;  %v1202_v30 = vld [vmem:[%s7884_s24 + $0x10] sm:$0xff] }
  0x56   : > { %s6928_s0 = sshll.u32 %s8600_s10, 4  ;;  %v1205_v31 = vld [vmem:[%s7884_s24 + $0x28] sm:$0xff]  ;;  %7187 = vmatprep.subr.mxu0 %v1202_v30  ;;  %v1204_v33 = vld [vmem:[%s7884_s24 + $0x20] sm:$0xff]  ;;  %v1203_v35 = vld [vmem:[%s7884_s24 + $0x18] sm:$0xff]  ;;  %vm2304_vm4 = vcmask 64512   ;;  %vm2746_vm5 = vcmask 1041408   ;;  %s1177_s15 = scalar_lea.vmem %s7839_s13, %s8600_s10 }
  0x57   : > { %s1174_s27 = scalar_lea.vmem %s7834_s9, %s6928_s0  ;;  %s1169_s11 = scalar_lea.vmem %s7829_s5, %s6928_s0  ;;  %7196 = vmatprep.subr.mxu1 %v1205_v31  ;;  %7188 = vmatpush3.msra.mxu0 %v1202_v30  ;;  %v1201_v32 = vld [vmem:[%s7884_s24 + $0x8] sm:$0xff]  ;;  %v1200_v34 = vld [vmem:[%s7884_s24] sm:$0xff]  ;;  %v1211_v37 = vld [vmem:[%s7884_s24 + $0x58] sm:$0xff]  ;;  %vm2684_vm8 = vcmask 76800   ;;  %vm2676_vm9 = vcmask 80896   ;;  %vm5038_vm10 = vcmask 1043456  }
  0x58   : > { %v1189_v1 = vld [vmem:[%s1174_s27] sm:$0xff]  ;;  %v1190_v2 = vld [vmem:[%s1174_s27 + $0x8] sm:$0xf]  ;;  %7197 = vmatpush3.msra.mxu1 %v1205_v31  ;;  %7189 = vmatprep.subr.mxu0 %v1201_v32  ;;  %v1207_v61 = vld [vmem:[%s7884_s24 + $0x38] sm:$0xff]  ;;  %s8585_s28 = sld [smem:[#allocation9_spill]]  ;;  %vm4976_vm13 = vcmask 93184  }
  0x59   : > { %v1187_v3 = vld [vmem:[%s1169_s11] sm:$0xff]  ;;  %v1281_v4 = vsel %vm1280_vm0, %v1189_v1, 0.0  ;;  %v1188_v6 = vld [vmem:[%s1169_s11 + $0x8] sm:$0x3]  ;;  %v1285_v8 = vsel %vm1284_vm3, %v1190_v2, 0.0  ;;  %7198 = vmatprep.subr.mxu1 %v1204_v33  ;;  %7190 = vmatpush3.msra.mxu0 %v1201_v32  ;;  %v1210_v0 = vld [vmem:[%s7884_s24 + $0x50] sm:$0xff] }
  0x5a   : > { %v1326_v5 = vsel %vm1325_vm1, %v1187_v3, 0.0  ;;  %1282 = vadd.xlane.f32.xlu0 %v1281_v4  ;;  %v1330_v7 = vsel %vm1329_vm2, %v1188_v6, 0.0  ;;  %7199 = vmatpush3.msra.mxu1 %v1204_v33  ;;  %v1208_v36 = vld [vmem:[%s7884_s24 + $0x40] sm:$0xff]  ;;  %v1222_v30 = vld [vmem:[%s7894_s6 + $0x10] sm:$0xff]  ;;  %v1227_v31 = vld [vmem:[%s7894_s6 + $0x38] sm:$0xff]  ;;  %s8586_s2 = sld [smem:[#allocation10_spill]] }
  0x5b   : > { %1327 = vadd.xlane.f32.xlu1 %v1326_v5  ;;  %v8031_v9 = vadd.f32 %v1330_v7, %v1326_v5  ;;  %7191 = vmatprep.subr.mxu0 %v1200_v34  ;;  %v6767_v51 = vld [vmem:[%s7854_s25] ss:$0 sm:$0xff]  ;;  %v1226_v32 = vld [vmem:[%s7894_s6 + $0x30] sm:$0xff]  ;;  %s8587_s0 = sld [smem:[#allocation14_spill]]  ;;  %vm4968_vm14 = vcmask 97280   ;;  %vm7820_vm15 = vmmov 0  }
  0x5c   : > { %7200 = vmatprep.subr.mxu1 %v1203_v35  ;;  %7192 = vmatpush3.msra.mxu0 %v1200_v34  ;;  %v6768_v53 = vld [vmem:[%s7859_s29] ss:$0 sm:$0xff]  ;;  %s8588_s27 = sld [smem:[#allocation11_spill]] }
  0x5d   : > { %7201 = vmatpush3.msra.mxu1 %v1203_v35  ;;  %7205 = vmatprep.subr.mxu0 %v1208_v36  ;;  %s8589_s11 = sld [smem:[#allocation3_spill]] }
  0x5e   : > { %1286 = vadd.xlane.f32.xlu0 %v1285_v8  ;;  %7214 = vmatprep.subr.mxu1 %v1211_v37  ;;  %v1217_v8 = vld [vmem:[%s7889_s30 + $0x28] sm:$0xff] }
  0x5f   : > { %1331 = vadd.xlane.f32.xlu1 %v1330_v7  ;;  %v1213_v7 = vld [vmem:[%s7889_s30 + $0x8] sm:$0xff] }
  0xe3   : > { %v1283_v10 = vpop.xlane.xlu0 %1282 }
  0xe4   : > { %v1328_v11 = vpop.xlane.xlu1 %1327  ;;  %v1289_v12 = vmul.f32 0.041666668, %v1283_v10 }
  0xe5   : > { %v1334_v13 = vmul.f32 0.0625, %v1328_v11 }
  0xe6   : > { %v1291_v14 = vsub.f32 %v1189_v1, %v1289_v12  ;;  %v6769_v1 = vld [vmem:[%s7864_s3] ss:$0 sm:$0xff] }
  0xe7   : > { %v8033_v15 = vsub.f32 %v1187_v3, %v1334_v13  ;;  %v1287_v16 = vpop.xlane.xlu0 %1286  ;;  %v1209_v3 = vld [vmem:[%s7884_s24 + $0x48] sm:$0xff]  ;;  %v6771_v12 = vld [vmem:[%s7874_s14] ss:$0 sm:$0xff] }
  0xe8   : > { %v1332_v17 = vpop.xlane.xlu1 %1331  ;;  %v1290_v18 = vmul.f32 0.041666668, %v1287_v16  ;;  %v1293_v19 = vmul.f32 %v1291_v14, %v1291_v14  ;;  %v1212_v13 = vld [vmem:[%s7889_s30] sm:$0xff] }
  0xe9   : > { %v1335_v20 = vmul.f32 0.0625, %v1332_v17  ;;  %v1338_v21 = vmul.f32 %v8033_v15, %v8033_v15 }
  0xea   : > { %v1292_v22 = vsub.f32 %v1190_v2, %v1290_v18  ;;  %v1295_v23 = vsel %vm1280_vm0, %v1293_v19, 0.0  ;;  %v1206_v2 = vld [vmem:[%s7884_s24 + $0x30] sm:$0xff]  ;;  %v1221_v18 = vld [vmem:[%s7894_s6 + $0x8] sm:$0xff]  ;;  %v6772_v19 = vld [vmem:[%s7879_s19] ss:$0 sm:$0xff] }
  0xeb   : > { %v8038_v24 = vsub.f32 %v1188_v6, %v1335_v20  ;;  %1296 = vadd.xlane.f32.xlu0 %v1295_v23  ;;  %v1340_v26 = vsel %vm1325_vm1, %v1338_v21, 0.0  ;;  %v6770_v6 = vld [vmem:[%s7869_s8] ss:$0 sm:$0xff] }
  0xec   : > { %v1294_v25 = vmul.f32 %v1292_v22, %v1292_v22  ;;  %v1220_v23 = vld [vmem:[%s7894_s6] sm:$0xff] }
  0xed   : > { %v1339_v27 = vmul.f32 %v8038_v24, %v8038_v24 }
  0xee   : > { %v1298_v28 = vsel %vm1284_vm3, %v1294_v25, 0.0  ;;  %v1225_v25 = vld [vmem:[%s7894_s6 + $0x28] sm:$0xff] }
  0xef   : > { %1299 = vadd.xlane.f32.xlu1 %v1298_v28  ;;  %1341 = vadd.xlane.f32.xlu0 %v1340_v26  ;;  %v1343_v29 = vsel %vm1329_vm2, %v1339_v27, 0.0  ;;  %v1218_v27 = vld [vmem:[%s7889_s30 + $0x30] sm:$0xff]  ;;  %v1224_v28 = vld [vmem:[%s7894_s6 + $0x20] sm:$0xff]  ;;  %vm6395_vm2 = vcmask 31744  }
  0xf3   : > { %1344 = vadd.xlane.f32.xlu1 %v1343_v29  ;;  %v1223_v29 = vld [vmem:[%s7894_s6 + $0x18] sm:$0xff] }
 0x174   : > { %v1297_v38 = vpop.xlane.xlu0 %1296 }
 0x175   : > { %v1301_v39 = vmul.f32 0.041666668, %v1297_v38 }
 0x177   : > { %v1303_v40 = vadd.f32 1e-05, %v1301_v39 }
 0x178   : > { %v1342_v41 = vpop.xlane.xlu0 %1341  ;;  %v1300_v42 = vpop.xlane.xlu1 %1299 }
 0x179   : > { %7705 = vrsqrt.f32 %v1303_v40  ;;  %v1346_v43 = vmul.f32 0.0625, %v1342_v41  ;;  %v1302_v44 = vmul.f32 0.041666668, %v1300_v42 }
 0x17b   : > { %v1304_v45 = vadd.f32 1e-05, %v1302_v44  ;;  %v1348_v47 = vadd.f32 1e-05, %v1346_v43 }
 0x17c   : > { %v1345_v46 = vpop.xlane.xlu1 %1344 }
 0x17d   : > { %v1347_v48 = vmul.f32 0.0625, %v1345_v46  ;;  %7707 = vrsqrt.f32 %v1304_v45 }
 0x17e   : > { %7709 = vrsqrt.f32 %v1348_v47 }
 0x17f   : > { %v1349_v49 = vadd.f32 1e-05, %v1347_v48 }
 0x181   : > { %7711 = vrsqrt.f32 %v1349_v49 }
 0x186   : > { %v7706_v50 = vpop.eup %7705 }
 0x187   : > { %v1307_v52 = vmul.f32 %v7706_v50, %v1291_v14  ;;  %v1216_v14 = vld [vmem:[%s7889_s30 + $0x20] sm:$0xff] }
 0x189   : > { %v1315_v54 = vmul.f32 %v6767_v51, %v1307_v52 }
 0x18a   : > { %v7708_v55 = vpop.eup %7707 }
 0x18b   : > { %v8055_v56 = vadd.f32 %v6768_v53, %v1315_v54  ;;  %v1308_v57 = vmul.f32 %v7708_v55, %v1292_v22  ;;  %v7710_v58 = vpop.eup %7709  ;;  %v1214_v22 = vld [vmem:[%s7889_s30 + $0x10] sm:$0xff]  ;;  %v7818_v55 = vmov 0  }
 0x18c   : > { %v1352_v62 = vmul.f32 %v7710_v58, %v8033_v15  ;;  %v1215_v15 = vld [vmem:[%s7889_s30 + $0x18] sm:$0xff]  ;;  %7704 = vset.pattern.permute.xlu0 %v7818_v55  ;;  %v1191_v58 = vld [vmem:[%s1177_s15] sm:$0x1]  ;;  %s1180_s15 = scalar_lea.vmem %s8589_s11, %s8600_s10  ;;  %s8597_s11 = sld [smem:[#allocation21_spill]] }
 0x18d   : > { %7193 = vmatprep.mubr.msk.f32.mxu0 %vm1280_vm0, %v8055_v56  ;;  %7202 = vmatprep.mubr.msk.f32.mxu1 %vm1280_vm0, %v8055_v56  ;;  %v1316_v59 = vmul.f32 %v6767_v51, %v1308_v57  ;;  %v2663_v57 = vlaneseq  ;;  %vm2661_vm6 = vcmp.gt.f32.partialorder %v1191_v58, 0.0 }
 0x18e   : > { %v7712_v63 = vpop.eup %7711  ;;  %v1360_v5 = vmul.f32 %v6769_v1, %v1352_v62  ;;  %v1376_v16 = vmul.f32 %v6771_v12, %v1352_v62 }
 0x18f   : > { %v8061_v60 = vadd.f32 %v6768_v53, %v1316_v59  ;;  %v1353_v4 = vmul.f32 %v7712_v63, %v8038_v24  ;;  %v1219_v24 = vld [vmem:[%s7889_s30 + $0x38] sm:$0xff] }
 0x190   : > { %v1368_v11 = vadd.f32 %v6770_v6, %v1360_v5  ;;  %v1384_v21 = vadd.f32 %v6772_v19, %v1376_v16 }
 0x191   : > { %7194 = vmatmul.mubr.msk.f32.vlgmr.msra.gmra.mxu0 %vm1280_vm0, %v8061_v60  ;;  %7203 = vmatmul.mubr.msk.f32.vlgmr.msra.gmra.mxu1 %vm1280_vm0, %v8061_v60  ;;  %v1361_v10 = vmul.f32 %v6769_v1, %v1353_v4  ;;  %v1377_v20 = vmul.f32 %v6771_v12, %v1353_v4  ;;  %v2662_v1 = vsel %vm2661_vm6, 1, %v7818_v55 }
 0x192   : > { %7206 = vmatpush3.msra.mxu0 %v1208_v36  ;;  %7215 = vmatpush3.msra.mxu1 %v1211_v37 }
 0x193   : > { %7207 = vmatprep.subr.mxu0 %v1207_v61  ;;  %7211 = vmatprep.mubr.msk.f32.mxu0 %vm1280_vm0, %v8055_v56  ;;  %v1369_v17 = vadd.f32 %v6770_v6, %v1361_v10  ;;  %v1385_v26 = vadd.f32 %v6772_v19, %v1377_v20 }
 0x194   : > { %7216 = vmatprep.subr.mxu1 %v1210_v0  ;;  %7220 = vmatprep.mubr.msk.f32.mxu1 %vm1280_vm0, %v8055_v56 }
 0x195   : > { %7208 = vmatpush3.msra.mxu0 %v1207_v61  ;;  %7217 = vmatpush3.msra.mxu1 %v1210_v0  ;;  %v8158_v61 = vshrl.u32 %v2663_v57, 7 }
 0x196   : > { %7209 = vmatprep.subr.mxu0 %v1206_v2  ;;  %7218 = vmatprep.subr.mxu1 %v1209_v3 }
 0x197   : > { %7210 = vmatpush3.msra.mxu0 %v1206_v2  ;;  %7219 = vmatpush3.msra.mxu1 %v1209_v3  ;;  %v2665_v0 = vsub.s32 0, %v8158_v61 }
 0x198   : > { %7212 = vmatmul.mubr.msk.f32.vlgmr.msra.gmra.mxu0 %vm1280_vm0, %v8061_v60  ;;  %7221 = vmatmul.mubr.msk.f32.vlgmr.msra.gmra.mxu1 %vm1280_vm0, %v8061_v60 }
 0x199   : > { %7223 = vmatprep.subr.mxu1 %v1213_v7  ;;  %7237 = vmatprep.subr.mxu0 %v1217_v8  ;;  %v2666_v4 = vrot.slane %v2662_v1, %v2665_v0 }
 0x19a   : > { %7224 = vmatpush3.msra.mxu1 %v1213_v7  ;;  %7227 = vmatprep.mubr.msk.f32.mxu1 %vm1325_vm1, %v1368_v11 }
 0x19b   : > { %7238 = vmatpush3.msra.mxu0 %v1217_v8  ;;  %7241 = vmatprep.mubr.msk.f32.mxu0 %vm1325_vm1, %v1368_v11  ;;  %vm2667_vm7 = vcmp.eq.s32.totalorder %v2666_v4, 1 }
 0x19c   : > { %7225 = vmatprep.subr.mxu1 %v1212_v13  ;;  %7239 = vmatprep.subr.mxu0 %v1216_v14 }
 0x19d   : > { %7226 = vmatpush3.msra.mxu1 %v1212_v13  ;;  %7240 = vmatpush3.msra.mxu0 %v1216_v14 }
 0x19e   : > { %7228 = vmatmul.mubr.msk.f32.vlgmr.msra.gmra.mxu1 %vm1325_vm1, %v1369_v17  ;;  %7230 = vmatprep.subr.mxu1 %v1215_v15 }
 0x19f   : > { %7242 = vmatmul.mubr.msk.f32.vlgmr.msra.gmra.mxu0 %vm1325_vm1, %v1369_v17  ;;  %7251 = vmatprep.subr.mxu0 %v1221_v18 }
 0x1a0   : > { %7231 = vmatpush3.msra.mxu1 %v1215_v15  ;;  %7234 = vmatprep.mubr.msk.f32.mxu1 %vm1325_vm1, %v1368_v11 }
 0x1a1   : > { %7252 = vmatpush3.msra.mxu0 %v1221_v18  ;;  %7255 = vmatprep.mubr.msk.f32.mxu0 %vm1325_vm1, %v1384_v21 }
 0x1a2   : > { %7232 = vmatprep.subr.mxu1 %v1214_v22  ;;  %7253 = vmatprep.subr.mxu0 %v1220_v23 }
 0x1a3   : > { %7233 = vmatpush3.msra.mxu1 %v1214_v22  ;;  %7254 = vmatpush3.msra.mxu0 %v1220_v23 }
 0x1a4   : > { %7235 = vmatmul.mubr.msk.f32.vlgmr.msra.gmra.mxu1 %vm1325_vm1, %v1369_v17  ;;  %7244 = vmatprep.subr.mxu1 %v1219_v24 }
 0x1a5   : > { %7256 = vmatmul.mubr.msk.f32.vlgmr.msra.gmra.mxu0 %vm1325_vm1, %v1385_v26  ;;  %7265 = vmatprep.subr.mxu0 %v1225_v25 }
 0x1a6   : > { %7245 = vmatpush3.msra.mxu1 %v1219_v24  ;;  %7248 = vmatprep.mubr.msk.f32.mxu1 %vm1325_vm1, %v1368_v11 }
 0x1a7   : > { %7266 = vmatpush3.msra.mxu0 %v1225_v25  ;;  %7269 = vmatprep.mubr.msk.f32.mxu0 %vm1325_vm1, %v1384_v21 }
 0x1a8   : > { %7246 = vmatprep.subr.mxu1 %v1218_v27  ;;  %7267 = vmatprep.subr.mxu0 %v1224_v28 }
 0x1a9   : > { %7247 = vmatpush3.msra.mxu1 %v1218_v27  ;;  %7268 = vmatpush3.msra.mxu0 %v1224_v28 }
 0x1aa   : > { %7249 = vmatmul.mubr.msk.f32.vlgmr.msra.gmra.mxu1 %vm1325_vm1, %v1369_v17  ;;  %7258 = vmatprep.subr.mxu1 %v1223_v29 }
 0x1ab   : > { %7270 = vmatmul.mubr.msk.f32.vlgmr.msra.gmra.mxu0 %vm1325_vm1, %v1385_v26  ;;  %7259 = vmatpush3.msra.mxu1 %v1223_v29 }
 0x1ac   : > { %7262 = vmatprep.mubr.msk.f32.mxu1 %vm1325_vm1, %v1384_v21  ;;  %7260 = vmatprep.subr.mxu1 %v1222_v30 }
 0x1ad   : > { %7261 = vmatpush3.msra.mxu1 %v1222_v30 }
 0x1ae   : > { %7263 = vmatmul.mubr.msk.f32.vlgmr.msra.gmra.mxu1 %vm1325_vm1, %v1385_v26  ;;  %7272 = vmatprep.subr.mxu1 %v1227_v31 }
 0x1af   : > { %7273 = vmatpush3.msra.mxu1 %v1227_v31  ;;  %7276 = vmatprep.mubr.msk.f32.mxu1 %vm1325_vm1, %v1384_v21 }
 0x1b0   : > { %7274 = vmatprep.subr.mxu1 %v1226_v32 }
 0x1b1   : > { %7275 = vmatpush3.msra.mxu1 %v1226_v32 }
 0x1b2   : > { %7277 = vmatmul.mubr.msk.f32.vlgmr.msra.gmra.mxu1 %vm1325_vm1, %v1385_v26 }
 0x251   : > { %v7195_v33 = vpop.f32.mrf.mxu0  ;;  %v7204_v34 = vpop.f32.mrf.mxu1 }
 0x253   : > { %v1458_v35 = vpop.f32.mrf.mxu0  ;;  %v1533_v36 = vpop.f32.mrf.mxu1 }
 0x254   : > { %7283 = vmatprep.mubr.msk.f32.mxu0 %vm2304_vm4, %v1458_v35  ;;  %7290 = vmatprep.mubr.msk.f32.mxu1 %vm2304_vm4, %v1533_v36 }
 0x258   : > { %v7222_v37 = vpop.f32.mrf.mxu1  ;;  %v7213_v38 = vpop.f32.mrf.mxu0 }
 0x25a   : > { %v1683_v39 = vpop.f32.mrf.mxu1  ;;  %v1608_v40 = vpop.f32.mrf.mxu0 }
 0x25e   : > { %v7229_v41 = vpop.f32.mrf.mxu1 }
 0x25f   : > { %7279 = vmatprep.subr.msk.mxu0 %vm2304_vm4, %v7229_v41  ;;  %v7243_v43 = vpop.f32.mrf.mxu0 }
 0x260   : > { %v1764_v42 = vpop.f32.mrf.mxu1  ;;  %7280 = vmatpush3.xpose.msk.msra.mxu0 %vm2304_vm4, %v7229_v41 }
 0x261   : > { %7281 = vmatprep.subr.msk.mxu0 %vm2304_vm4, %v1764_v42  ;;  %v1914_v45 = vpop.f32.mrf.mxu0 }
 0x264   : > { %v7236_v44 = vpop.f32.mrf.mxu1  ;;  %7282 = vmatpush3.xpose.msk.msra.mxu0 %vm2304_vm4, %v1764_v42 }
 0x265   : > { %7286 = vmatprep.subr.msk.mxu1 %vm2304_vm4, %v7236_v44  ;;  %7293 = vmatprep.subr.msk.mxu0 %vm2304_vm4, %v7243_v43  ;;  %v7257_v47 = vpop.f32.mrf.mxu0 }
 0x266   : > { %v1839_v46 = vpop.f32.mrf.mxu1  ;;  %7287 = vmatpush3.xpose.msk.msra.mxu1 %vm2304_vm4, %v7236_v44 }
 0x267   : > { %7288 = vmatprep.subr.msk.mxu1 %vm2304_vm4, %v1839_v46  ;;  %7284 = vmatmul.mubr.msk.f32.vlgmr.msra.gmra.mxu0 %vm2304_vm4, %v7195_v33  ;;  %v2070_v50 = vpop.f32.mrf.mxu0 }
 0x268   : > { %7294 = vmatpush3.xpose.msk.msra.mxu0 %vm2304_vm4, %v7243_v43  ;;  %7297 = vmatprep.mubr.msk.f32.mxu0 %vm2304_vm4, %v1608_v40 }
 0x269   : > { %7295 = vmatprep.subr.msk.mxu0 %vm2304_vm4, %v1914_v45 }
 0x26a   : > { %v7250_v48 = vpop.f32.mrf.mxu1  ;;  %7289 = vmatpush3.xpose.msk.msra.mxu1 %vm2304_vm4, %v1839_v46 }
 0x26b   : > { %7300 = vmatprep.subr.msk.mxu1 %vm2304_vm4, %v7250_v48  ;;  %v8141_v52 = vpop.f32.mrf.mxu0 }
 0x26c   : > { %v1989_v49 = vpop.f32.mrf.mxu1  ;;  %7296 = vmatpush3.xpose.msk.msra.mxu0 %vm2304_vm4, %v1914_v45 }
 0x26d   : > { %7291 = vmatmul.mubr.msk.f32.vlgmr.msra.gmra.mxu1 %vm2304_vm4, %v7204_v34  ;;  %7307 = vmatprep.subr.msk.mxu0 %vm2746_vm5, %v7257_v47  ;;  %v8156_v59 = vpop.f32.mrf.mxu0 }
 0x26e   : > { %7301 = vmatpush3.xpose.msk.msra.mxu1 %vm2304_vm4, %v7250_v48  ;;  %7304 = vmatprep.mubr.msk.f32.mxu1 %vm2304_vm4, %v1683_v39  ;;  %v7264_v51 = vpop.f32.mrf.mxu1 }
 0x26f   : > { %7302 = vmatprep.subr.msk.mxu1 %vm2304_vm4, %v1989_v49  ;;  %7298 = vmatmul.mubr.msk.f32.vlgmr.msra.gmra.mxu0 %vm2304_vm4, %v7213_v38 }
 0x270   : > { %7308 = vmatpush3.msk.msra.mxu0 %vm2746_vm5, %v7257_v47  ;;  %v2145_v53 = vpop.f32.mrf.mxu1 }
 0x271   : > { %7309 = vmatprep.subr.mxu0 %v2070_v50 }
 0x272   : > { %7303 = vmatpush3.xpose.msk.msra.mxu1 %vm2304_vm4, %v1989_v49  ;;  %7310 = vmatpush3.msra.mxu0 %v2070_v50  ;;  %v8149_v54 = vpop.f32.mrf.mxu1 }
 0x273   : > { %7314 = vmatprep.subr.msk.mxu1 %vm2746_vm5, %v7264_v51  ;;  %7321 = vmatprep.subr.msk.mxu0 %vm2746_vm5, %v8141_v52 }
 0x274   : > { %v8160_v63 = vpop.f32.mrf.mxu1 }
 0x275   : > { %7305 = vmatmul.mubr.msk.f32.vlgmr.msra.gmra.mxu1 %vm2304_vm4, %v7222_v37 }
 0x276   : > { %7315 = vmatpush3.msk.msra.mxu1 %vm2746_vm5, %v7264_v51 }
 0x277   : > { %7316 = vmatprep.subr.mxu1 %v2145_v53 }
 0x278   : > { %7317 = vmatpush3.msra.mxu1 %v2145_v53 }
 0x279   : > { %7328 = vmatprep.subr.msk.mxu1 %vm2746_vm5, %v8149_v54 }
 0x327   : > { %v7285_v62 = vpop.f32.mrf.mxu0 }
 0x328   : > { %v2654_v10 = vmul.f32 0.35355338, %v7285_v62 }
 0x329   : > { %v2383_v2 = vpop.f32.mrf.mxu0 }
 0x32a   : > { %v2653_v15 = vmul.f32 0.35355338, %v2383_v2  ;;  %v2669_v17 = vsel %vm2667_vm7, %v2654_v10, -1e+30 }
 0x32b   : > { %v2685_v26 = vsel %vm2684_vm8, %v2669_v17, -inf }
 0x32c   : > { %v2668_v27 = vsel %vm2667_vm7, %v2653_v15, -1e+30 }
 0x32d   : > { %v7292_v3 = vpop.f32.mrf.mxu1  ;;  %v2677_v36 = vsel %vm2676_vm9, %v2668_v27, -inf }
 0x32e   : > { %v2656_v11 = vmul.f32 0.35355338, %v7292_v3 }
 0x32f   : > { %v7299_v5 = vpop.f32.mrf.mxu0  ;;  %v2470_v7 = vpop.f32.mrf.mxu1 }
 0x330   : > { %v2658_v6 = vmul.f32 0.35355338, %v7299_v5  ;;  %v2655_v13 = vmul.f32 0.35355338, %v2470_v7  ;;  %v2671_v18 = vsel %vm2667_vm7, %v2656_v11, -1e+30 }
 0x331   : > { %v2557_v8 = vpop.f32.mrf.mxu0  ;;  %v2686_v28 = vsel %vm2684_vm8, %v2671_v18, -inf }
 0x332   : > { %v2657_v12 = vmul.f32 0.35355338, %v2557_v8  ;;  %v2673_v14 = vsel %vm2667_vm7, %v2658_v6, -1e+30  ;;  %v2670_v23 = vsel %vm2667_vm7, %v2655_v13, -1e+30 }
 0x333   : > { %v2687_v20 = vsel %vm2684_vm8, %v2673_v14, -inf  ;;  %v2678_v34 = vsel %vm2676_vm9, %v2670_v23, -inf }
 0x334   : > { %v2672_v21 = vsel %vm2667_vm7, %v2657_v12, -1e+30  ;;  %v2688_v30 = vmax.f32 %v2685_v26, %v2687_v20 }
 0x335   : > { %v7306_v16 = vpop.f32.mrf.mxu1  ;;  %v2679_v31 = vsel %vm2676_vm9, %v2672_v21, -inf }
 0x336   : > { %v2660_v19 = vmul.f32 0.35355338, %v7306_v16  ;;  %v2680_v39 = vmax.f32 %v2677_v36, %v2679_v31  ;;  %v1231_v36 = vld [vmem:[%s7899_s12 + $0x18] sm:$0xff] }
 0x337   : > { %v2644_v22 = vpop.f32.mrf.mxu1 }
 0x338   : > { %v2675_v24 = vsel %vm2667_vm7, %v2660_v19, -1e+30  ;;  %v2659_v25 = vmul.f32 0.35355338, %v2644_v22 }
 0x339   : > { %v2689_v29 = vsel %vm2684_vm8, %v2675_v24, -inf }
 0x33a   : > { %v2690_v32 = vmax.f32 %v2686_v28, %v2689_v29  ;;  %v2674_v33 = vsel %vm2667_vm7, %v2659_v25, -1e+30 }
 0x33b   : > { %v2681_v35 = vsel %vm2676_vm9, %v2674_v33, -inf }
 0x33c   : > { %v2691_v37 = vmax.f32 %v2688_v30, %v2690_v32  ;;  %v2682_v38 = vmax.f32 %v2678_v34, %v2681_v35  ;;  %v1230_v35 = vld [vmem:[%s7899_s12 + $0x10] sm:$0xff] }
 0x33e   : > { %v2693_v40 = vsub.f32 %v2669_v17, %v2691_v37  ;;  %v2695_v41 = vsub.f32 %v2671_v18, %v2691_v37  ;;  %v2697_v42 = vsub.f32 %v2673_v14, %v2691_v37  ;;  %v2699_v43 = vsub.f32 %v2675_v24, %v2691_v37 }
 0x33f   : > { %v2683_v44 = vmax.f32 %v2680_v39, %v2682_v38  ;;  %v3417_v39 = vld [vmem:[%s7904_s20 + $0x10] sm:$0xff] }
 0x340   : > { %v2702_v45 = vmul.f32 1.442695, %v2693_v40  ;;  %v2706_v46 = vmul.f32 1.442695, %v2695_v41  ;;  %v2710_v47 = vmul.f32 1.442695, %v2697_v42 }
 0x341   : > { %v2714_v48 = vmul.f32 1.442695, %v2699_v43  ;;  %v2692_v49 = vsub.f32 %v2668_v27, %v2683_v44  ;;  %v2694_v50 = vsub.f32 %v2670_v23, %v2683_v44  ;;  %v2696_v51 = vsub.f32 %v2672_v21, %v2683_v44 }
 0x342   : > { %7713 = vpow2.f32 %v2702_v45  ;;  %v2698_v53 = vsub.f32 %v2674_v33, %v2683_v44  ;;  %v3416_v44 = vld [vmem:[%s7904_s20 + $0x8] sm:$0xff]  ;;  %v3415_v45 = vld [vmem:[%s7904_s20] sm:$0xff] }
 0x343   : > { %7715 = vpow2.f32 %v2706_v46  ;;  %v2700_v57 = vmul.f32 1.442695, %v2692_v49  ;;  %v2704_v58 = vmul.f32 1.442695, %v2694_v50  ;;  %v2708_v62 = vmul.f32 1.442695, %v2696_v51 }
 0x344   : > { %7717 = vpow2.f32 %v2710_v47  ;;  %v2712_v1 = vmul.f32 1.442695, %v2698_v53  ;;  %v3420_v46 = vld [vmem:[%s7904_s20 + $0x28] sm:$0xff]  ;;  %v3419_v47 = vld [vmem:[%s7904_s20 + $0x20] sm:$0xff] }
 0x345   : > { %7719 = vpow2.f32 %v2714_v48  ;;  %v3418_v48 = vld [vmem:[%s7904_s20 + $0x18] sm:$0xff] }
 0x346   : > { %7721 = vpow2.f32 %v2700_v57 }
 0x347   : > { %7723 = vpow2.f32 %v2704_v58 }
 0x348   : > { %7725 = vpow2.f32 %v2708_v62 }
 0x349   : > { %7727 = vpow2.f32 %v2712_v1 }
 0x34f   : > { %v7714_v2 = vpop.eup %7713 }
 0x350   : > { %v7716_v3 = vpop.eup %7715  ;;  %v2723_v4 = vsel %vm2684_vm8, %v7714_v2, 0.0 }
 0x351   : > { %v7718_v5 = vpop.eup %7717  ;;  %v2724_v6 = vsel %vm2684_vm8, %v7716_v3, 0.0 }
 0x352   : > { %v7720_v7 = vpop.eup %7719  ;;  %v2725_v8 = vadd.f32 %v2724_v6, %v2723_v4  ;;  %v2726_v11 = vsel %vm2684_vm8, %v7718_v5, 0.0 }
 0x353   : > { %v7722_v10 = vpop.eup %7721  ;;  %v2728_v18 = vsel %vm2684_vm8, %v7720_v7, 0.0 }
 0x354   : > { %v7724_v12 = vpop.eup %7723  ;;  %v2727_v13 = vadd.f32 %v2726_v11, %v2725_v8  ;;  %v2716_v14 = vsel %vm2676_vm9, %v7722_v10, 0.0 }
 0x355   : > { %v7726_v15 = vpop.eup %7725  ;;  %v2717_v16 = vsel %vm2676_vm9, %v7724_v12, 0.0 }
 0x356   : > { %v7728_v17 = vpop.eup %7727  ;;  %v2718_v19 = vadd.f32 %v2717_v16, %v2716_v14  ;;  %v2729_v20 = vadd.f32 %v2728_v18, %v2727_v13  ;;  %v2719_v21 = vsel %vm2676_vm9, %v7726_v15, 0.0  ;;  %v6837_v18 = vld [vmem:[%s8579_s16] ss:$0 sm:$0xff]  ;;  %s8590_s16 = sld [smem:[#allocation15_spill]] }
 0x357   : > { %v2721_v23 = vsel %vm2676_vm9, %v7728_v17, 0.0 }
 0x358   : > { %v2720_v22 = vadd.f32 %v2719_v21, %v2718_v19  ;;  %7729 = vrcp.f32 %v2729_v20 }
 0x35a   : > { %v2722_v24 = vadd.f32 %v2721_v23, %v2720_v22 }
 0x35c   : > { %7731 = vrcp.f32 %v2722_v24 }
 0x365   : > { %v7730_v25 = vpop.eup %7729 }
 0x366   : > { %v2733_v29 = vmul.f32 %v7730_v25, %v7714_v2  ;;  %v2735_v30 = vmul.f32 %v7730_v25, %v7716_v3  ;;  %v2737_v33 = vmul.f32 %v7730_v25, %v7718_v5  ;;  %v2739_v34 = vmul.f32 %v7730_v25, %v7720_v7 }
 0x369   : > { %v7732_v26 = vpop.eup %7731 }
 0x36a   : > { %v2732_v27 = vmul.f32 %v7732_v26, %v7722_v10  ;;  %v2734_v28 = vmul.f32 %v7732_v26, %v7724_v12  ;;  %v2736_v31 = vmul.f32 %v7732_v26, %v7726_v15  ;;  %v2738_v32 = vmul.f32 %v7732_v26, %v7728_v17 }
 0x36c   : > { %7311 = vmatprep.mubr.msk.f32.mxu0 %vm2676_vm9, %v2732_v27  ;;  %7318 = vmatprep.mubr.msk.f32.mxu1 %vm2676_vm9, %v2734_v28 }
 0x36d   : > { %7312 = vmatmul.mubr.msk.f32.vlgmr.msra.gmra.mxu0 %vm2676_vm9, %v2733_v29  ;;  %7319 = vmatmul.mubr.msk.f32.vlgmr.msra.gmra.mxu1 %vm2676_vm9, %v2735_v30 }
 0x36e   : > { %7322 = vmatpush3.msk.msra.mxu0 %vm2746_vm5, %v8141_v52  ;;  %7329 = vmatpush3.msk.msra.mxu1 %vm2746_vm5, %v8149_v54  ;;  %v1228_v52 = vld [vmem:[%s7899_s12] sm:$0xff]  ;;  %v1229_v54 = vld [vmem:[%s7899_s12 + $0x8] sm:$0xff] }
 0x36f   : > { %7323 = vmatprep.subr.mxu0 %v8156_v59  ;;  %7325 = vmatprep.mubr.msk.f32.mxu0 %vm2676_vm9, %v2736_v31 }
 0x370   : > { %7330 = vmatprep.subr.mxu1 %v8160_v63  ;;  %7332 = vmatprep.mubr.msk.f32.mxu1 %vm2676_vm9, %v2738_v32 }
 0x371   : > { %7324 = vmatpush3.msra.mxu0 %v8156_v59  ;;  %7331 = vmatpush3.msra.mxu1 %v8160_v63 }
 0x372   : > { %7326 = vmatmul.mubr.msk.f32.vlgmr.msra.gmra.mxu0 %vm2676_vm9, %v2737_v33  ;;  %7333 = vmatmul.mubr.msk.f32.vlgmr.msra.gmra.mxu1 %vm2676_vm9, %v2739_v34 }
 0x373   : > { %7335 = vmatprep.subr.mxu0 %v1228_v52  ;;  %7340 = vmatprep.subr.mxu1 %v1229_v54 }
 0x374   : > { %7336 = vmatpush3.msra.mxu0 %v1228_v52  ;;  %7341 = vmatpush3.msra.mxu1 %v1229_v54 }
 0x375   : > { %7345 = vmatprep.subr.mxu0 %v1230_v35  ;;  %7350 = vmatprep.subr.mxu1 %v1231_v36 }
 0x42d   : > { %v7313_v37 = vpop.f32.mrf.mxu0  ;;  %v7320_v38 = vpop.f32.mrf.mxu1 }
 0x42f   : > { %v2816_v59 = vpop.f32.mrf.mxu0  ;;  %v2900_v63 = vpop.f32.mrf.mxu1 }
 0x430   : > { %7337 = vmatprep.mubr.msk.f32.mxu0 %vm2304_vm4, %v2816_v59  ;;  %7342 = vmatprep.mubr.msk.f32.mxu1 %vm2304_vm4, %v2900_v63 }
 0x431   : > { %7338 = vmatmul.mubr.msk.f32.vlgmr.msra.gmra.mxu0 %vm2304_vm4, %v7313_v37  ;;  %7343 = vmatmul.mubr.msk.f32.vlgmr.msra.gmra.mxu1 %vm2304_vm4, %v7320_v38 }
 0x432   : > { %v7327_v40 = vpop.f32.mrf.mxu0  ;;  %v7334_v41 = vpop.f32.mrf.mxu1  ;;  %7346 = vmatpush3.msra.mxu0 %v1230_v35  ;;  %7351 = vmatpush3.msra.mxu1 %v1231_v36 }
 0x433   : > { %7364 = vmatprep.subr.mxu1 %v3417_v39  ;;  %7355 = vmatprep.subr.mxu0 %v3420_v46 }
 0x434   : > { %v2984_v42 = vpop.f32.mrf.mxu0  ;;  %v3068_v43 = vpop.f32.mrf.mxu1 }
 0x435   : > { %7347 = vmatprep.mubr.msk.f32.mxu0 %vm2304_vm4, %v2984_v42  ;;  %7352 = vmatprep.mubr.msk.f32.mxu1 %vm2304_vm4, %v3068_v43 }
 0x436   : > { %7348 = vmatmul.mubr.msk.f32.vlgmr.msra.gmra.mxu0 %vm2304_vm4, %v7327_v40  ;;  %7353 = vmatmul.mubr.msk.f32.vlgmr.msra.gmra.mxu1 %vm2304_vm4, %v7334_v41 }
 0x437   : > { %7365 = vmatpush3.msra.mxu1 %v3417_v39  ;;  %7370 = vmatprep.mubr.msk.f32.mxu1 %vm1280_vm0, %v8055_v56 }
 0x438   : > { %7366 = vmatprep.subr.mxu1 %v3416_v44  ;;  %7356 = vmatpush3.msra.mxu0 %v3420_v46 }
 0x439   : > { %7367 = vmatpush3.msra.mxu1 %v3416_v44  ;;  %7357 = vmatprep.subr.mxu0 %v3419_v47 }
 0x43a   : > { %7368 = vmatprep.subr.mxu1 %v3415_v45  ;;  %7358 = vmatpush3.msra.mxu0 %v3419_v47 }
 0x43b   : > { %7369 = vmatpush3.msra.mxu1 %v3415_v45  ;;  %7359 = vmatprep.subr.mxu0 %v3418_v48 }
 0x43c   : > { %7371 = vmatmul.mubr.msk.f32.vlgmr.msra.gmra.mxu1 %vm1280_vm0, %v8061_v60  ;;  %7360 = vmatpush3.msra.mxu0 %v3418_v48  ;;  %v1241_v48 = vld [vmem:[%s8580_s18 + $0x10] sm:$0xff] }
 0x43d   : > { %7373 = vmatprep.subr.mxu0 %v1241_v48 }
 0x4f1   : > { %v7339_v49 = vpop.f32.mrf.mxu0  ;;  %v7344_v50 = vpop.f32.mrf.mxu1 }
 0x4f2   : > { %v3408_v57 = vsel %vm1284_vm3, %v7339_v49, 0.0  ;;  %v3409_v58 = vsel %vm1284_vm3, %v7344_v50, 0.0  ;;  %v1244_v49 = vld [vmem:[%s8580_s18 + $0x28] sm:$0xff] }
 0x4f3   : > { %v3149_v51 = vpop.f32.mrf.mxu0  ;;  %v3230_v53 = vpop.f32.mrf.mxu1  ;;  %v3410_v4 = vadd.f32 %v3409_v58, %v3408_v57  ;;  %v1240_v50 = vld [vmem:[%s8580_s18 + $0x8] sm:$0xff]  ;;  %7382 = vmatprep.subr.mxu1 %v1244_v49  ;;  %v1242_v57 = vld [vmem:[%s8580_s18 + $0x18] sm:$0xff]  ;;  %v1247_v58 = vld [vmem:[%s8580_s18 + $0x40] sm:$0xff] }
 0x4f4   : > { %v3401_v62 = vsel %vm1280_vm0, %v3149_v51, 0.0  ;;  %v3402_v1 = vsel %vm1280_vm0, %v3230_v53, 0.0  ;;  %v1243_v51 = vld [vmem:[%s8580_s18 + $0x20] sm:$0xff]  ;;  %7383 = vmatpush3.msra.mxu1 %v1244_v49  ;;  %v1273_v49 = vld [vmem:[%s8587_s0 + $0x50] sm:$0xff] }
 0x4f5   : > { %v3403_v6 = vadd.f32 %v3402_v1, %v3401_v62  ;;  %v1239_v53 = vld [vmem:[%s8580_s18] sm:$0xff]  ;;  %7384 = vmatprep.subr.mxu1 %v1243_v51  ;;  %v1250_v62 = vld [vmem:[%s8580_s18 + $0x58] sm:$0xff] }
 0x4f6   : > { %v7349_v2 = vpop.f32.mrf.mxu0  ;;  %v7354_v3 = vpop.f32.mrf.mxu1  ;;  %7385 = vmatpush3.msra.mxu1 %v1243_v51  ;;  %v1272_v51 = vld [vmem:[%s8587_s0 + $0x48] sm:$0xff] }
 0x4f7   : > { %v3411_v5 = vsel %vm1284_vm3, %v7349_v2, 0.0  ;;  %v3413_v14 = vsel %vm1284_vm3, %v7354_v3, 0.0  ;;  %7386 = vmatprep.subr.mxu1 %v1242_v57 }
 0x4f8   : > { %v3311_v7 = vpop.f32.mrf.mxu0  ;;  %v3392_v8 = vpop.f32.mrf.mxu1  ;;  %v3412_v10 = vadd.f32 %v3411_v5, %v3410_v4  ;;  %7387 = vmatpush3.msra.mxu1 %v1242_v57 }
 0x4f9   : > { %v3404_v11 = vsel %vm1280_vm0, %v3311_v7, 0.0  ;;  %v3406_v13 = vsel %vm1280_vm0, %v3392_v8, 0.0  ;;  %7400 = vmatprep.subr.mxu1 %v1250_v62  ;;  %v6840_v8 = vld [vmem:[%s8581_s22] ss:$0 sm:$0xff]  ;;  %s8591_s22 = sld [smem:[#allocation16_spill]] }
 0x4fa   : > { %v3405_v12 = vadd.f32 %v3404_v11, %v3403_v6  ;;  %v3414_v16 = vadd.f32 %v3413_v14, %v3412_v10  ;;  %v6841_v14 = vld [vmem:[%s8582_s23] ss:$0 sm:$0xff]  ;;  %s8592_s23 = sld [smem:[#allocation20_spill]] }
 0x4fc   : > { %v3407_v15 = vadd.f32 %v3406_v13, %v3405_v12  ;;  %v7372_v17 = vpop.f32.mrf.mxu1 }
 0x4fe   : > { %7361 = vmatprep.mubr.msk.f32.mxu0 %vm1280_vm0, %v3407_v15  ;;  %v3568_v21 = vpop.f32.mrf.mxu1 }
 0x4ff   : > { %7362 = vmatmul.mubr.msk.f32.vlgmr.msra.gmra.mxu0 %vm1280_vm0, %v3414_v16 }
 0x500   : > { %7374 = vmatpush3.msra.mxu0 %v1241_v48  ;;  %v1270_v48 = vld [vmem:[%s8587_s0 + $0x38] sm:$0xff] }
 0x501   : > { %7375 = vmatprep.subr.mxu0 %v1240_v50 }
 0x502   : > { %7376 = vmatpush3.msra.mxu0 %v1240_v50  ;;  %v1269_v50 = vld [vmem:[%s8587_s0 + $0x30] sm:$0xff] }
 0x503   : > { %7377 = vmatprep.subr.mxu0 %v1239_v53 }
 0x504   : > { %7378 = vmatpush3.msra.mxu0 %v1239_v53 }
 0x505   : > { %7391 = vmatprep.subr.mxu0 %v1247_v58 }
 0x5bf   : > { %v7363_v19 = vpop.f32.mrf.mxu0 }
 0x5c0   : > { %v3574_v20 = vadd.f32 %v7372_v17, %v7363_v19  ;;  %v1249_v19 = vld [vmem:[%s8580_s18 + $0x50] sm:$0xff] }
 0x5c1   : > { %v3493_v22 = vpop.f32.mrf.mxu0 }
 0x5c2   : > { %v3584_v23 = vadd.f32 %v6837_v18, %v3574_v20  ;;  %v3569_v24 = vadd.f32 %v3568_v21, %v3493_v22  ;;  %v1245_v20 = vld [vmem:[%s8580_s18 + $0x30] sm:$0xff]  ;;  %v1248_v21 = vld [vmem:[%s8580_s18 + $0x48] sm:$0xff]  ;;  %v6842_v22 = vld [vmem:[%s8583_s26] ss:$0 sm:$0xff]  ;;  %s8593_s26 = sld [smem:[#allocation18_spill]] }
 0x5c4   : > { %v6839_v25 = vmul.f32 -1.442695, %v3584_v23  ;;  %v3583_v26 = vadd.f32 %v6837_v18, %v3569_v24  ;;  %v1246_v18 = vld [vmem:[%s8580_s18 + $0x38] sm:$0xff]  ;;  %v1253_v24 = vld [vmem:[%s8584_s1 + $0x10] sm:$0xff] }
 0x5c6   : > { %7733 = vpow2.f32 %v6839_v25  ;;  %v6838_v27 = vmul.f32 -1.442695, %v3583_v26  ;;  %v1256_v25 = vld [vmem:[%s8584_s1 + $0x28] sm:$0xff]  ;;  %v6843_v26 = vld [vmem:[%s8585_s28] ss:$0 sm:$0xff]  ;;  %s8594_s28 = sld [smem:[#allocation17_spill]] }
 0x5c8   : > { %7735 = vpow2.f32 %v6838_v27 }
 0x5d3   : > { %v7734_v28 = vpop.eup %7733 }
 0x5d4   : > { %v3592_v29 = vadd.f32 1.0, %v7734_v28  ;;  %v1252_v28 = vld [vmem:[%s8584_s1 + $0x8] sm:$0xff] }
 0x5d5   : > { %v7736_v30 = vpop.eup %7735 }
 0x5d6   : > { %7737 = vrcp.f32 %v3592_v29  ;;  %v3591_v31 = vadd.f32 1.0, %v7736_v30  ;;  %v1255_v29 = vld [vmem:[%s8584_s1 + $0x20] sm:$0xff] }
 0x5d8   : > { %7739 = vrcp.f32 %v3591_v31  ;;  %v1251_v31 = vld [vmem:[%s8584_s1] sm:$0xff] }
 0x5e3   : > { %v7738_v32 = vpop.eup %7737 }
 0x5e4   : > { %v3600_v33 = vsub.f32 1.0, %v7738_v32  ;;  %v3598_v52 = vmul.f32 %v7738_v32, %v8061_v60  ;;  %v1254_v32 = vld [vmem:[%s8584_s1 + $0x18] sm:$0xff] }
 0x5e5   : > { %v7740_v34 = vpop.eup %7739 }
 0x5e6   : > { %v3602_v54 = vmul.f32 %v3600_v33, %v3414_v16  ;;  %v3599_v35 = vsub.f32 1.0, %v7740_v34  ;;  %v3597_v37 = vmul.f32 %v7740_v34, %v8055_v56  ;;  %v1259_v34 = vld [vmem:[%s8584_s1 + $0x40] sm:$0xff] }
 0x5e8   : > { %v3604_v36 = vadd.f32 %v3602_v54, %v3598_v52  ;;  %v3601_v38 = vmul.f32 %v3599_v35, %v3407_v15  ;;  %v1262_v52 = vld [vmem:[%s8584_s1 + $0x58] sm:$0xff]  ;;  %v1261_v35 = vld [vmem:[%s8584_s1 + $0x50] sm:$0xff] }
 0x5e9   : > { %v1258_v54 = vld [vmem:[%s8584_s1 + $0x38] sm:$0xff] }
 0x5ea   : > { %v3608_v59 = vsel %vm1284_vm3, %v3604_v36, 0.0  ;;  %v3603_v63 = vadd.f32 %v3601_v38, %v3597_v37  ;;  %v1260_v37 = vld [vmem:[%s8584_s1 + $0x48] sm:$0xff]  ;;  %v6844_v38 = vld [vmem:[%s8586_s2] ss:$0 sm:$0xff]  ;;  %s8595_s2 = sld [smem:[#allocation22_spill]] }
 0x5eb   : > { %3609 = vadd.xlane.f32.xlu1 %v3608_v59 }
 0x5ec   : > { %v3605_v39 = vsel %vm1280_vm0, %v3603_v63, 0.0 }
 0x5ed   : > { %3606 = vadd.xlane.f32.xlu0 %v3605_v39  ;;  %v1268_v39 = vld [vmem:[%s8587_s0 + $0x28] sm:$0xff] }
 0x674   : > { %v3610_v40 = vpop.xlane.xlu1 %3609 }
 0x675   : > { %v3612_v41 = vmul.f32 0.041666668, %v3610_v40  ;;  %v6845_v40 = vld [vmem:[%s8588_s27] ss:$0 sm:$0xff]  ;;  %s8596_s27 = sld [smem:[#allocation19_spill]] }
 0x676   : > { %v3607_v60 = vpop.xlane.xlu0 %3606 }
 0x677   : > { %v3614_v42 = vsub.f32 %v3604_v36, %v3612_v41  ;;  %v3611_v43 = vmul.f32 0.041666668, %v3607_v60  ;;  %v1257_v36 = vld [vmem:[%s8584_s1 + $0x30] sm:$0xff]  ;;  %v1264_v60 = vld [vmem:[%s8587_s0 + $0x8] sm:$0xff] }
 0x679   : > { %v3613_v44 = vsub.f32 %v3603_v63, %v3611_v43  ;;  %v3616_v56 = vmul.f32 %v3614_v42, %v3614_v42  ;;  %v1265_v63 = vld [vmem:[%s8587_s0 + $0x10] sm:$0xff] }
 0x67b   : > { %v3620_v45 = vsel %vm1284_vm3, %v3616_v56, 0.0  ;;  %v3615_v46 = vmul.f32 %v3613_v44, %v3613_v44  ;;  %v1266_v56 = vld [vmem:[%s8587_s0 + $0x18] sm:$0xff] }
 0x67c   : > { %3621 = vadd.xlane.f32.xlu1 %v3620_v45 }
 0x67d   : > { %v3617_v47 = vsel %vm1280_vm0, %v3615_v46, 0.0  ;;  %v1271_v46 = vld [vmem:[%s8587_s0 + $0x40] sm:$0xff] }
 0x67e   : > { %3618 = vadd.xlane.f32.xlu0 %v3617_v47  ;;  %v1274_v47 = vld [vmem:[%s8587_s0 + $0x58] sm:$0xff] }
 0x705   : > { %v3622_v1 = vpop.xlane.xlu1 %3621 }
 0x706   : > { %v3624_v2 = vmul.f32 0.041666668, %v3622_v1 }
 0x707   : > { %v3619_v3 = vpop.xlane.xlu0 %3618 }
 0x708   : > { %v3626_v4 = vadd.f32 1e-05, %v3624_v2  ;;  %v3623_v5 = vmul.f32 0.041666668, %v3619_v3 }
 0x70a   : > { %7741 = vrsqrt.f32 %v3626_v4  ;;  %v3625_v6 = vadd.f32 1e-05, %v3623_v5 }
 0x70c   : > { %7743 = vrsqrt.f32 %v3625_v6 }
 0x717   : > { %v7742_v7 = vpop.eup %7741 }
 0x718   : > { %v8254_v10 = vmul.f32 %v7742_v7, %v3614_v42  ;;  %v1267_v42 = vld [vmem:[%s8587_s0 + $0x20] sm:$0xff] }
 0x719   : > { %v7744_v11 = vpop.eup %7743 }
 0x71a   : > { %v8256_v12 = vmul.f32 %v7744_v11, %v3613_v44  ;;  %v3638_v13 = vmul.f32 %v6840_v8, %v8254_v10  ;;  %v3654_v30 = vmul.f32 %v6842_v22, %v8254_v10  ;;  %v3670_v43 = vmul.f32 %v6844_v38, %v8254_v10  ;;  %v1263_v44 = vld [vmem:[%s8587_s0] sm:$0xff] }
 0x71c   : > { %v3637_v15 = vmul.f32 %v6840_v8, %v8256_v12  ;;  %v8263_v17 = vadd.f32 %v6841_v14, %v3638_v13  ;;  %v3653_v23 = vmul.f32 %v6842_v22, %v8256_v12  ;;  %v3662_v33 = vadd.f32 %v6843_v26, %v3654_v30  ;;  %v1192_v22 = vld [vmem:[%s1180_s15] sm:$0x1]  ;;  %s8598_s15 = sld [smem:[#allocation4_spill]] }
 0x71d   : > { %v3669_v59 = vmul.f32 %v6844_v38, %v8256_v12  ;;  %v3678_v45 = vadd.f32 %v6845_v40, %v3670_v43  ;;  %vm4953_vm11 = vcmp.gt.f32.partialorder %v1192_v22, 0.0 }
 0x71e   : > { %v8261_v16 = vadd.f32 %v6841_v14, %v3637_v15  ;;  %v3661_v27 = vadd.f32 %v6843_v26, %v3653_v23 }
 0x71f   : > { %v3677_v41 = vadd.f32 %v6845_v40, %v3669_v59 }
 0x720   : > { %7379 = vmatprep.mubr.msk.f32.mxu0 %vm1280_vm0, %v8261_v16  ;;  %7388 = vmatprep.mubr.msk.f32.mxu1 %vm1280_vm0, %v8261_v16 }
 0x721   : > { %7380 = vmatmul.mubr.msk.f32.vlgmr.msra.gmra.mxu0 %vm1280_vm0, %v8263_v17  ;;  %7389 = vmatmul.mubr.msk.f32.vlgmr.msra.gmra.mxu1 %vm1280_vm0, %v8263_v17 }
 0x722   : > { %7392 = vmatpush3.msra.mxu0 %v1247_v58  ;;  %7401 = vmatpush3.msra.mxu1 %v1250_v62 }
 0x723   : > { %7393 = vmatprep.subr.mxu0 %v1246_v18  ;;  %7397 = vmatprep.mubr.msk.f32.mxu0 %vm1280_vm0, %v8261_v16 }
 0x724   : > { %7402 = vmatprep.subr.mxu1 %v1249_v19  ;;  %7406 = vmatprep.mubr.msk.f32.mxu1 %vm1280_vm0, %v8261_v16 }
 0x725   : > { %7394 = vmatpush3.msra.mxu0 %v1246_v18  ;;  %7403 = vmatpush3.msra.mxu1 %v1249_v19 }
 0x726   : > { %7395 = vmatprep.subr.mxu0 %v1245_v20  ;;  %7404 = vmatprep.subr.mxu1 %v1248_v21 }
 0x727   : > { %7396 = vmatpush3.msra.mxu0 %v1245_v20  ;;  %7405 = vmatpush3.msra.mxu1 %v1248_v21 }
 0x728   : > { %7398 = vmatmul.mubr.msk.f32.vlgmr.msra.gmra.mxu0 %vm1280_vm0, %v8263_v17  ;;  %7407 = vmatmul.mubr.msk.f32.vlgmr.msra.gmra.mxu1 %vm1280_vm0, %v8263_v17 }
 0x729   : > { %7409 = vmatprep.subr.mxu0 %v1253_v24  ;;  %7418 = vmatprep.subr.mxu1 %v1256_v25 }
 0x72a   : > { %7410 = vmatpush3.msra.mxu0 %v1253_v24  ;;  %7415 = vmatprep.mubr.msk.f32.mxu0 %vm1280_vm0, %v3661_v27 }
 0x72b   : > { %7419 = vmatpush3.msra.mxu1 %v1256_v25  ;;  %7424 = vmatprep.mubr.msk.f32.mxu1 %vm1280_vm0, %v3661_v27  ;;  %v4954_v25 = vsel %vm4953_vm11, 1, %v7818_v55 }
 0x72c   : > { %7411 = vmatprep.subr.mxu0 %v1252_v28  ;;  %7420 = vmatprep.subr.mxu1 %v1255_v29 }
 0x72d   : > { %7412 = vmatpush3.msra.mxu0 %v1252_v28  ;;  %7421 = vmatpush3.msra.mxu1 %v1255_v29  ;;  %v4958_v28 = vrot.slane %v4954_v25, %v2665_v0 }
 0x72e   : > { %7413 = vmatprep.subr.mxu0 %v1251_v31  ;;  %7422 = vmatprep.subr.mxu1 %v1254_v32 }
 0x72f   : > { %7414 = vmatpush3.msra.mxu0 %v1251_v31  ;;  %7423 = vmatpush3.msra.mxu1 %v1254_v32  ;;  %vm4959_vm12 = vcmp.eq.s32.totalorder %v4958_v28, 1 }
 0x730   : > { %7416 = vmatmul.mubr.msk.f32.vlgmr.msra.gmra.mxu0 %vm1280_vm0, %v3662_v33  ;;  %7425 = vmatmul.mubr.msk.f32.vlgmr.msra.gmra.mxu1 %vm1280_vm0, %v3662_v33 }
 0x731   : > { %7427 = vmatprep.subr.mxu0 %v1259_v34  ;;  %7436 = vmatprep.subr.mxu1 %v1262_v52 }
 0x732   : > { %7428 = vmatpush3.msra.mxu0 %v1259_v34  ;;  %7433 = vmatprep.mubr.msk.f32.mxu0 %vm1280_vm0, %v3661_v27 }
 0x733   : > { %7437 = vmatpush3.msra.mxu1 %v1262_v52  ;;  %7442 = vmatprep.mubr.msk.f32.mxu1 %vm1280_vm0, %v3661_v27 }
 0x734   : > { %7429 = vmatprep.subr.mxu0 %v1258_v54  ;;  %7438 = vmatprep.subr.mxu1 %v1261_v35 }
 0x735   : > { %7430 = vmatpush3.msra.mxu0 %v1258_v54  ;;  %7439 = vmatpush3.msra.mxu1 %v1261_v35 }
 0x736   : > { %7431 = vmatprep.subr.mxu0 %v1257_v36  ;;  %7440 = vmatprep.subr.mxu1 %v1260_v37 }
 0x737   : > { %7432 = vmatpush3.msra.mxu0 %v1257_v36  ;;  %7441 = vmatpush3.msra.mxu1 %v1260_v37 }
 0x738   : > { %7434 = vmatmul.mubr.msk.f32.vlgmr.msra.gmra.mxu0 %vm1280_vm0, %v3662_v33  ;;  %7443 = vmatmul.mubr.msk.f32.vlgmr.msra.gmra.mxu1 %vm1280_vm0, %v3662_v33 }
 0x739   : > { %7445 = vmatprep.subr.mxu0 %v1265_v63  ;;  %7454 = vmatprep.subr.mxu1 %v1268_v39 }
 0x73a   : > { %7446 = vmatpush3.msra.mxu0 %v1265_v63  ;;  %7451 = vmatprep.mubr.msk.f32.mxu0 %vm1280_vm0, %v3677_v41 }
 0x73b   : > { %7455 = vmatpush3.msra.mxu1 %v1268_v39  ;;  %7460 = vmatprep.mubr.msk.f32.mxu1 %vm1280_vm0, %v3677_v41 }
 0x73c   : > { %7447 = vmatprep.subr.mxu0 %v1264_v60  ;;  %7456 = vmatprep.subr.mxu1 %v1267_v42 }
 0x73d   : > { %7448 = vmatpush3.msra.mxu0 %v1264_v60  ;;  %7457 = vmatpush3.msra.mxu1 %v1267_v42 }
 0x73e   : > { %7449 = vmatprep.subr.mxu0 %v1263_v44  ;;  %7458 = vmatprep.subr.mxu1 %v1266_v56 }
 0x73f   : > { %7450 = vmatpush3.msra.mxu0 %v1263_v44  ;;  %7459 = vmatpush3.msra.mxu1 %v1266_v56 }
 0x740   : > { %7452 = vmatmul.mubr.msk.f32.vlgmr.msra.gmra.mxu0 %vm1280_vm0, %v3678_v45  ;;  %7461 = vmatmul.mubr.msk.f32.vlgmr.msra.gmra.mxu1 %vm1280_vm0, %v3678_v45 }
 0x741   : > { %7463 = vmatprep.subr.mxu0 %v1271_v46  ;;  %7472 = vmatprep.subr.mxu1 %v1274_v47 }
 0x742   : > { %7464 = vmatpush3.msra.mxu0 %v1271_v46  ;;  %7469 = vmatprep.mubr.msk.f32.mxu0 %vm1280_vm0, %v3677_v41 }
 0x743   : > { %7473 = vmatpush3.msra.mxu1 %v1274_v47  ;;  %7478 = vmatprep.mubr.msk.f32.mxu1 %vm1280_vm0, %v3677_v41 }
 0x744   : > { %7465 = vmatprep.subr.mxu0 %v1270_v48  ;;  %7474 = vmatprep.subr.mxu1 %v1273_v49 }
 0x745   : > { %7466 = vmatpush3.msra.mxu0 %v1270_v48  ;;  %7475 = vmatpush3.msra.mxu1 %v1273_v49 }
 0x746   : > { %7467 = vmatprep.subr.mxu0 %v1269_v50  ;;  %7476 = vmatprep.subr.mxu1 %v1272_v51 }
 0x747   : > { %7468 = vmatpush3.msra.mxu0 %v1269_v50  ;;  %7477 = vmatpush3.msra.mxu1 %v1272_v51 }
 0x748   : > { %7470 = vmatmul.mubr.msk.f32.vlgmr.msra.gmra.mxu0 %vm1280_vm0, %v3678_v45  ;;  %7479 = vmatmul.mubr.msk.f32.vlgmr.msra.gmra.mxu1 %vm1280_vm0, %v3678_v45 }
 0x7e1   : > { %v7381_v53 = vpop.f32.mrf.mxu0  ;;  %v7390_v57 = vpop.f32.mrf.mxu1 }
 0x7e3   : > { %v3751_v58 = vpop.f32.mrf.mxu0  ;;  %v3826_v62 = vpop.f32.mrf.mxu1 }
 0x7e4   : > { %7485 = vmatprep.mubr.msk.f32.mxu0 %vm2304_vm4, %v3751_v58  ;;  %7492 = vmatprep.mubr.msk.f32.mxu1 %vm2304_vm4, %v3826_v62 }
 0x7e8   : > { %v7399_v1 = vpop.f32.mrf.mxu0  ;;  %v7408_v2 = vpop.f32.mrf.mxu1 }
 0x7ea   : > { %v3901_v3 = vpop.f32.mrf.mxu0  ;;  %v3976_v4 = vpop.f32.mrf.mxu1 }
 0x7f0   : > { %v7417_v5 = vpop.f32.mrf.mxu0  ;;  %v7426_v6 = vpop.f32.mrf.mxu1 }
 0x7f1   : > { %7481 = vmatprep.subr.msk.mxu0 %vm2304_vm4, %v7417_v5  ;;  %7488 = vmatprep.subr.msk.mxu1 %vm2304_vm4, %v7426_v6 }
 0x7f2   : > { %v4057_v7 = vpop.f32.mrf.mxu0  ;;  %v4132_v8 = vpop.f32.mrf.mxu1  ;;  %7482 = vmatpush3.xpose.msk.msra.mxu0 %vm2304_vm4, %v7417_v5  ;;  %7489 = vmatpush3.xpose.msk.msra.mxu1 %vm2304_vm4, %v7426_v6 }
 0x7f3   : > { %7483 = vmatprep.subr.msk.mxu0 %vm2304_vm4, %v4057_v7  ;;  %7490 = vmatprep.subr.msk.mxu1 %vm2304_vm4, %v4132_v8 }
 0x7f6   : > { %7484 = vmatpush3.xpose.msk.msra.mxu0 %vm2304_vm4, %v4057_v7  ;;  %7491 = vmatpush3.xpose.msk.msra.mxu1 %vm2304_vm4, %v4132_v8 }
 0x7f8   : > { %v7435_v10 = vpop.f32.mrf.mxu0  ;;  %v7444_v11 = vpop.f32.mrf.mxu1 }
 0x7f9   : > { %7495 = vmatprep.subr.msk.mxu0 %vm2304_vm4, %v7435_v10  ;;  %7502 = vmatprep.subr.msk.mxu1 %vm2304_vm4, %v7444_v11 }
 0x7fa   : > { %7486 = vmatmul.mubr.msk.f32.vlgmr.msra.gmra.mxu0 %vm2304_vm4, %v7381_v53  ;;  %7493 = vmatmul.mubr.msk.f32.vlgmr.msra.gmra.mxu1 %vm2304_vm4, %v7390_v57  ;;  %v4207_v12 = vpop.f32.mrf.mxu0  ;;  %v4282_v13 = vpop.f32.mrf.mxu1 }
 0x7fb   : > { %7496 = vmatpush3.xpose.msk.msra.mxu0 %vm2304_vm4, %v7435_v10  ;;  %7499 = vmatprep.mubr.msk.f32.mxu0 %vm2304_vm4, %v3901_v3 }
 0x7fc   : > { %7503 = vmatpush3.xpose.msk.msra.mxu1 %vm2304_vm4, %v7444_v11  ;;  %7506 = vmatprep.mubr.msk.f32.mxu1 %vm2304_vm4, %v3976_v4 }
 0x7fd   : > { %7497 = vmatprep.subr.msk.mxu0 %vm2304_vm4, %v4207_v12  ;;  %7504 = vmatprep.subr.msk.mxu1 %vm2304_vm4, %v4282_v13 }
 0x7ff   : > { %7498 = vmatpush3.xpose.msk.msra.mxu0 %vm2304_vm4, %v4207_v12 }
 0x800   : > { %v7453_v14 = vpop.f32.mrf.mxu0  ;;  %v7462_v15 = vpop.f32.mrf.mxu1  ;;  %7505 = vmatpush3.xpose.msk.msra.mxu1 %vm2304_vm4, %v4282_v13 }
 0x801   : > { %7509 = vmatprep.subr.msk.mxu0 %vm5038_vm10, %v7453_v14  ;;  %7516 = vmatprep.subr.msk.mxu1 %vm5038_vm10, %v7462_v15 }
 0x802   : > { %7500 = vmatmul.mubr.msk.f32.vlgmr.msra.gmra.mxu0 %vm2304_vm4, %v7399_v1  ;;  %v4363_v18 = vpop.f32.mrf.mxu0  ;;  %v4438_v19 = vpop.f32.mrf.mxu1 }
 0x803   : > { %7507 = vmatmul.mubr.msk.f32.vlgmr.msra.gmra.mxu1 %vm2304_vm4, %v7408_v2  ;;  %7510 = vmatpush3.msk.msra.mxu0 %vm5038_vm10, %v7453_v14 }
 0x804   : > { %7517 = vmatpush3.msk.msra.mxu1 %vm5038_vm10, %v7462_v15  ;;  %7511 = vmatprep.subr.mxu0 %v4363_v18 }
 0x805   : > { %7518 = vmatprep.subr.mxu1 %v4438_v19  ;;  %7512 = vmatpush3.msra.mxu0 %v4363_v18 }
 0x806   : > { %7519 = vmatpush3.msra.mxu1 %v4438_v19 }
 0x808   : > { %v8361_v20 = vpop.f32.mrf.mxu0  ;;  %v8363_v21 = vpop.f32.mrf.mxu1 }
 0x809   : > { %7523 = vmatprep.subr.msk.mxu0 %vm5038_vm10, %v8361_v20  ;;  %7530 = vmatprep.subr.msk.mxu1 %vm5038_vm10, %v8363_v21 }
 0x80a   : > { %v8371_v23 = vpop.f32.mrf.mxu0  ;;  %v8373_v24 = vpop.f32.mrf.mxu1 }
 0x8ba   : > { %v7487_v26 = vpop.f32.mrf.mxu0  ;;  %v7494_v27 = vpop.f32.mrf.mxu1 }
 0x8bb   : > { %v4946_v31 = vmul.f32 0.35355338, %v7487_v26  ;;  %v4948_v32 = vmul.f32 0.35355338, %v7494_v27 }
 0x8bc   : > { %v4675_v29 = vpop.f32.mrf.mxu0  ;;  %v4762_v30 = vpop.f32.mrf.mxu1 }
 0x8bd   : > { %v4945_v33 = vmul.f32 0.35355338, %v4675_v29  ;;  %v4947_v34 = vmul.f32 0.35355338, %v4762_v30  ;;  %v4961_v54 = vsel %vm4959_vm12, %v4946_v31, -1e+30 }
 0x8be   : > { %v4963_v55 = vsel %vm4959_vm12, %v4948_v32, -1e+30  ;;  %v4977_v40 = vsel %vm4976_vm13, %v4961_v54, -inf }
 0x8bf   : > { %v4960_v37 = vsel %vm4959_vm12, %v4945_v33, -1e+30  ;;  %v4962_v38 = vsel %vm4959_vm12, %v4947_v34, -1e+30  ;;  %v4978_v43 = vsel %vm4976_vm13, %v4963_v55, -inf }
 0x8c0   : > { %v4969_v46 = vsel %vm4968_vm14, %v4960_v37, -inf  ;;  %v4970_v50 = vsel %vm4968_vm14, %v4962_v38, -inf }
 0x8c2   : > { %v7501_v52 = vpop.f32.mrf.mxu0 }
 0x8c3   : > { %v4950_v35 = vmul.f32 0.35355338, %v7501_v52  ;;  %v7508_v36 = vpop.f32.mrf.mxu1 }
 0x8c4   : > { %v4952_v61 = vmul.f32 0.35355338, %v7508_v36  ;;  %v4849_v0 = vpop.f32.mrf.mxu0 }
 0x8c5   : > { %v4965_v59 = vsel %vm4959_vm12, %v4950_v35, -1e+30  ;;  %v4949_v63 = vmul.f32 0.35355338, %v4849_v0  ;;  %v4936_v39 = vpop.f32.mrf.mxu1 }
 0x8c6   : > { %v4979_v41 = vsel %vm4976_vm13, %v4965_v59, -inf  ;;  %v4967_v60 = vsel %vm4959_vm12, %v4952_v61, -1e+30  ;;  %v4951_v42 = vmul.f32 0.35355338, %v4936_v39 }
 0x8c7   : > { %v4980_v44 = vmax.f32 %v4977_v40, %v4979_v41  ;;  %v4981_v56 = vsel %vm4976_vm13, %v4967_v60, -inf  ;;  %v4964_v45 = vsel %vm4959_vm12, %v4949_v63, -1e+30 }
 0x8c8   : > { %v4982_v47 = vmax.f32 %v4978_v43, %v4981_v56  ;;  %v4971_v48 = vsel %vm4968_vm14, %v4964_v45, -inf  ;;  %v4966_v49 = vsel %vm4959_vm12, %v4951_v42, -1e+30 }
 0x8c9   : > { %v4972_v51 = vmax.f32 %v4969_v46, %v4971_v48  ;;  %v4973_v53 = vsel %vm4968_vm14, %v4966_v49, -inf  ;;  %v1278_v48 = vld [vmem:[%s8590_s16 + $0x18] sm:$0xff] }
 0x8ca   : > { %v4983_v57 = vmax.f32 %v4980_v44, %v4982_v47  ;;  %v4974_v58 = vmax.f32 %v4970_v50, %v4973_v53  ;;  %v1277_v47 = vld [vmem:[%s8590_s16 + $0x10] sm:$0xff] }
 0x8cc   : > { %v4985_v62 = vsub.f32 %v4961_v54, %v4983_v57  ;;  %v4987_v1 = vsub.f32 %v4963_v55, %v4983_v57  ;;  %v4989_v2 = vsub.f32 %v4965_v59, %v4983_v57  ;;  %v4991_v3 = vsub.f32 %v4967_v60, %v4983_v57 }
 0x8cd   : > { %v4975_v4 = vmax.f32 %v4972_v51, %v4974_v58  ;;  %v5709_v51 = vld [vmem:[%s8591_s22 + $0x10] sm:$0xff] }
 0x8ce   : > { %v4994_v5 = vmul.f32 1.442695, %v4985_v62  ;;  %v4998_v6 = vmul.f32 1.442695, %v4987_v1  ;;  %v5002_v7 = vmul.f32 1.442695, %v4989_v2 }
 0x8cf   : > { %v5006_v8 = vmul.f32 1.442695, %v4991_v3  ;;  %v4984_v10 = vsub.f32 %v4960_v37, %v4975_v4  ;;  %v4986_v11 = vsub.f32 %v4962_v38, %v4975_v4  ;;  %v4988_v12 = vsub.f32 %v4964_v45, %v4975_v4  ;;  %v5708_v1 = vld [vmem:[%s8591_s22 + $0x8] sm:$0xff]  ;;  %v5707_v2 = vld [vmem:[%s8591_s22] sm:$0xff] }
 0x8d0   : > { %7745 = vpow2.f32 %v4994_v5  ;;  %v4990_v13 = vsub.f32 %v4966_v49, %v4975_v4  ;;  %v5712_v3 = vld [vmem:[%s8591_s22 + $0x28] sm:$0xff]  ;;  %v5711_v4 = vld [vmem:[%s8591_s22 + $0x20] sm:$0xff]  ;;  %v5710_v5 = vld [vmem:[%s8591_s22 + $0x18] sm:$0xff] }
 0x8d1   : > { %7747 = vpow2.f32 %v4998_v6  ;;  %v4992_v14 = vmul.f32 1.442695, %v4984_v10  ;;  %v4996_v15 = vmul.f32 1.442695, %v4986_v11  ;;  %v5000_v18 = vmul.f32 1.442695, %v4988_v12 }
 0x8d2   : > { %7749 = vpow2.f32 %v5002_v7  ;;  %v5004_v19 = vmul.f32 1.442695, %v4990_v13 }
 0x8d3   : > { %7751 = vpow2.f32 %v5006_v8 }
 0x8d4   : > { %7753 = vpow2.f32 %v4992_v14 }
 0x8d5   : > { %7755 = vpow2.f32 %v4996_v15 }
 0x8d6   : > { %7757 = vpow2.f32 %v5000_v18 }
 0x8d7   : > { %7759 = vpow2.f32 %v5004_v19 }
 0x8dd   : > { %v7746_v22 = vpop.eup %7745 }
 0x8de   : > { %v7748_v25 = vpop.eup %7747  ;;  %v5015_v26 = vsel %vm4976_vm13, %v7746_v22, 0.0 }
 0x8df   : > { %v7750_v27 = vpop.eup %7749  ;;  %v5016_v28 = vsel %vm4976_vm13, %v7748_v25, 0.0 }
 0x8e0   : > { %v7752_v29 = vpop.eup %7751  ;;  %v5017_v30 = vadd.f32 %v5016_v28, %v5015_v26  ;;  %v5018_v32 = vsel %vm4976_vm13, %v7750_v27, 0.0 }
 0x8e1   : > { %v7754_v31 = vpop.eup %7753  ;;  %v5020_v55 = vsel %vm4976_vm13, %v7752_v29, 0.0 }
 0x8e2   : > { %v7756_v33 = vpop.eup %7755  ;;  %v5019_v34 = vadd.f32 %v5018_v32, %v5017_v30  ;;  %v5008_v52 = vsel %vm4968_vm14, %v7754_v31, 0.0 }
 0x8e3   : > { %v7758_v54 = vpop.eup %7757  ;;  %v5009_v35 = vsel %vm4968_vm14, %v7756_v33, 0.0 }
 0x8e4   : > { %v7760_v36 = vpop.eup %7759  ;;  %v5010_v37 = vadd.f32 %v5009_v35, %v5008_v52  ;;  %v5021_v61 = vadd.f32 %v5020_v55, %v5019_v34  ;;  %v5011_v0 = vsel %vm4968_vm14, %v7758_v54, 0.0  ;;  %v5982_v52 = vld [vmem:[%s8592_s23 + $0x10] sm:$0xff]  ;;  %v5898_v35 = vrot.slane %v8031_v9, 4 }
 0x8e5   : > { %v5013_v59 = vsel %vm4968_vm14, %v7760_v36, 0.0 }
 0x8e6   : > { %v5012_v38 = vadd.f32 %v5011_v0, %v5010_v37  ;;  %7761 = vrcp.f32 %v5021_v61  ;;  %v5899_v55 = vadd.f32 %v5898_v35, %v8031_v9 }
 0x8e8   : > { %v5014_v63 = vadd.f32 %v5013_v59, %v5012_v38  ;;  %v5900_v37 = vrot.slane %v5899_v55, 2  ;;  %v5905_v38 = vld [vmem:[%s8593_s26 + $0x8] sm:$0xff] }
 0x8ea   : > { %7763 = vrcp.f32 %v5014_v63  ;;  %v5901_v61 = vadd.f32 %v5900_v37, %v5899_v55  ;;  %v7819_v63 = vmov 0.0   ;;  %v6239_v37 = vld [vmem:[%s8595_s2 + $0x50] sm:$0xff] }
 0x8ec   : > { %v5902_v0 = vrot.slane %v5901_v61, 1 }
 0x8ee   : > { %v5903_v59 = vadd.f32 %v5902_v0, %v5901_v61  ;;  %v6238_v61 = vld [vmem:[%s8595_s2 + $0x48] sm:$0xff]  ;;  %v6237_v0 = vld [vmem:[%s8595_s2 + $0x40] sm:$0xff] }
 0x8f3   : > { %v7762_v39 = vpop.eup %7761 }
 0x8f4   : > { %v5025_v42 = vmul.f32 %v7762_v39, %v7746_v22  ;;  %v5027_v43 = vmul.f32 %v7762_v39, %v7748_v25  ;;  %v5029_v45 = vmul.f32 %v7762_v39, %v7750_v27  ;;  %v5031_v46 = vmul.f32 %v7762_v39, %v7752_v29  ;;  %v5904_v39 = vld [vmem:[%s8593_s26] sm:$0xff] }
 0x8f7   : > { %v7764_v40 = vpop.eup %7763 }
 0x8f8   : > { %v5024_v41 = vmul.f32 %v7764_v40, %v7754_v31  ;;  %v5026_v60 = vmul.f32 %v7764_v40, %v7756_v33  ;;  %v5028_v44 = vmul.f32 %v7764_v40, %v7758_v54  ;;  %v5030_v56 = vmul.f32 %v7764_v40, %v7760_v36  ;;  %v5981_v54 = vld [vmem:[%s8592_s23 + $0x8] sm:$0xff]  ;;  %v5980_v36 = vld [vmem:[%s8592_s23] sm:$0xff] }
 0x8f9   : > { %v6910_v40 = vld [vmem:[%s8594_s28] ss:$0 sm:$0xff]  ;;  %s1183_s28 = scalar_lea.vmem %s8598_s15, %s8600_s10 }
 0x8fa   : > { %7513 = vmatprep.mubr.msk.f32.mxu0 %vm4968_vm14, %v5024_v41  ;;  %7520 = vmatprep.mubr.msk.f32.mxu1 %vm4968_vm14, %v5026_v60 }
 0x8fb   : > { %7514 = vmatmul.mubr.msk.f32.vlgmr.msra.gmra.mxu0 %vm4968_vm14, %v5025_v42  ;;  %7521 = vmatmul.mubr.msk.f32.vlgmr.msra.gmra.mxu1 %vm4968_vm14, %v5027_v43 }
 0x8fc   : > { %7524 = vmatpush3.msk.msra.mxu0 %vm5038_vm10, %v8361_v20  ;;  %7531 = vmatpush3.msk.msra.mxu1 %vm5038_vm10, %v8363_v21  ;;  %v1275_v20 = vld [vmem:[%s8590_s16] sm:$0xff]  ;;  %v1276_v21 = vld [vmem:[%s8590_s16 + $0x8] sm:$0xff] }
 0x8fd   : > { %7525 = vmatprep.subr.mxu0 %v8371_v23  ;;  %7527 = vmatprep.mubr.msk.f32.mxu0 %vm4968_vm14, %v5028_v44 }
 0x8fe   : > { %7532 = vmatprep.subr.mxu1 %v8373_v24  ;;  %7534 = vmatprep.mubr.msk.f32.mxu1 %vm4968_vm14, %v5030_v56 }
 0x8ff   : > { %7526 = vmatpush3.msra.mxu0 %v8371_v23  ;;  %7533 = vmatpush3.msra.mxu1 %v8373_v24 }
 0x900   : > { %7528 = vmatmul.mubr.msk.f32.vlgmr.msra.gmra.mxu0 %vm4968_vm14, %v5029_v45  ;;  %7535 = vmatmul.mubr.msk.f32.vlgmr.msra.gmra.mxu1 %vm4968_vm14, %v5031_v46 }
 0x901   : > { %7537 = vmatprep.subr.mxu0 %v1275_v20  ;;  %7542 = vmatprep.subr.mxu1 %v1276_v21 }
 0x902   : > { %7538 = vmatpush3.msra.mxu0 %v1275_v20  ;;  %7543 = vmatpush3.msra.mxu1 %v1276_v21 }
 0x903   : > { %7547 = vmatprep.subr.mxu0 %v1277_v47  ;;  %7552 = vmatprep.subr.mxu1 %v1278_v48 }
 0x9bb   : > { %v7515_v49 = vpop.f32.mrf.mxu0  ;;  %v7522_v50 = vpop.f32.mrf.mxu1 }
 0x9bd   : > { %v5108_v23 = vpop.f32.mrf.mxu0  ;;  %v5192_v24 = vpop.f32.mrf.mxu1 }
 0x9be   : > { %7539 = vmatprep.mubr.msk.f32.mxu0 %vm2304_vm4, %v5108_v23  ;;  %7544 = vmatprep.mubr.msk.f32.mxu1 %vm2304_vm4, %v5192_v24 }
 0x9bf   : > { %7540 = vmatmul.mubr.msk.f32.vlgmr.msra.gmra.mxu0 %vm2304_vm4, %v7515_v49  ;;  %7545 = vmatmul.mubr.msk.f32.vlgmr.msra.gmra.mxu1 %vm2304_vm4, %v7522_v50 }
 0x9c0   : > { %v7529_v53 = vpop.f32.mrf.mxu0  ;;  %v7536_v57 = vpop.f32.mrf.mxu1  ;;  %7548 = vmatpush3.msra.mxu0 %v1277_v47  ;;  %7553 = vmatpush3.msra.mxu1 %v1278_v48 }
 0x9c1   : > { %7566 = vmatprep.subr.mxu1 %v5709_v51  ;;  %7557 = vmatprep.subr.mxu0 %v5712_v3 }
 0x9c2   : > { %v5276_v58 = vpop.f32.mrf.mxu0  ;;  %v5360_v62 = vpop.f32.mrf.mxu1 }
 0x9c3   : > { %7549 = vmatprep.mubr.msk.f32.mxu0 %vm2304_vm4, %v5276_v58  ;;  %7554 = vmatprep.mubr.msk.f32.mxu1 %vm2304_vm4, %v5360_v62 }
 0x9c4   : > { %7550 = vmatmul.mubr.msk.f32.vlgmr.msra.gmra.mxu0 %vm2304_vm4, %v7529_v53  ;;  %7555 = vmatmul.mubr.msk.f32.vlgmr.msra.gmra.mxu1 %vm2304_vm4, %v7536_v57 }
 0x9c5   : > { %7567 = vmatpush3.msra.mxu1 %v5709_v51  ;;  %7572 = vmatprep.mubr.msk.f32.mxu1 %vm1280_vm0, %v8261_v16 }
 0x9c6   : > { %7568 = vmatprep.subr.mxu1 %v5708_v1  ;;  %7558 = vmatpush3.msra.mxu0 %v5712_v3  ;;  %v6085_v3 = vld [vmem:[%s8595_s2 + $0x18] sm:$0xff] }
 0x9c7   : > { %7569 = vmatpush3.msra.mxu1 %v5708_v1  ;;  %7559 = vmatprep.subr.mxu0 %v5711_v4 }
 0x9c8   : > { %7570 = vmatprep.subr.mxu1 %v5707_v2  ;;  %7560 = vmatpush3.msra.mxu0 %v5711_v4  ;;  %v6089_v4 = vld [vmem:[%s8595_s2 + $0x38] sm:$0xff] }
 0x9c9   : > { %7571 = vmatpush3.msra.mxu1 %v5707_v2  ;;  %7561 = vmatprep.subr.mxu0 %v5710_v5 }
 0x9ca   : > { %7573 = vmatmul.mubr.msk.f32.vlgmr.msra.gmra.mxu1 %vm1280_vm0, %v8263_v17  ;;  %7562 = vmatpush3.msra.mxu0 %v5710_v5  ;;  %v5906_v5 = vld [vmem:[%s8596_s27] sm:$0x1]  ;;  %s1186_s27 = scalar_lea.vmem %s8012_s4, %s8600_s10 }
 0x9cb   : > { %7582 = vmatprep.subr.mxu1 %v5982_v52  ;;  %7575 = vmatprep.subr.mxu0 %v7819_v63 }
 0x9cc   : > { %7583 = vmatpush3.msra.mxu1 %v5982_v52 }
 0x9cd   : > { %7584 = vmatprep.subr.mxu1 %v5981_v54 }
 0x9ce   : > { %7585 = vmatpush3.msra.mxu1 %v5981_v54 }
 0x9cf   : > { %7586 = vmatprep.subr.mxu1 %v5980_v36 }
 0x9d0   : > { %7587 = vmatpush3.msra.mxu1 %v5980_v36  ;;  %v6240_v36 = vld [vmem:[%s8595_s2 + $0x58] sm:$0xff] }
 0x9d1   : > { %7602 = vmatprep.subr.mxu1 %v7819_v63 }
 0xa7f   : > { %v7541_v6 = vpop.f32.mrf.mxu0  ;;  %v7546_v7 = vpop.f32.mrf.mxu1 }
 0xa80   : > { %v5700_v11 = vsel %vm1284_vm3, %v7541_v6, 0.0  ;;  %v5701_v12 = vsel %vm1284_vm3, %v7546_v7, 0.0  ;;  %v6082_v7 = vld [vmem:[%s8595_s2] sm:$0xff] }
 0xa81   : > { %v5441_v8 = vpop.f32.mrf.mxu0  ;;  %v5522_v10 = vpop.f32.mrf.mxu1  ;;  %v5702_v19 = vadd.f32 %v5701_v12, %v5700_v11  ;;  %v6319_v11 = vld [vmem:[%s8595_s2 + $0x78] sm:$0xff] }
 0xa82   : > { %v5693_v13 = vsel %vm1280_vm0, %v5441_v8, 0.0  ;;  %v5694_v14 = vsel %vm1280_vm0, %v5522_v10, 0.0  ;;  %v6088_v10 = vld [vmem:[%s8595_s2 + $0x30] sm:$0xff] }
 0xa83   : > { %v5695_v25 = vadd.f32 %v5694_v14, %v5693_v13  ;;  %v6087_v13 = vld [vmem:[%s8595_s2 + $0x28] sm:$0xff]  ;;  %v6318_v14 = vld [vmem:[%s8595_s2 + $0x70] sm:$0xff] }
 0xa84   : > { %v7551_v15 = vpop.f32.mrf.mxu0  ;;  %v7556_v18 = vpop.f32.mrf.mxu1 }
 0xa85   : > { %v5703_v22 = vsel %vm1284_vm3, %v7551_v15, 0.0  ;;  %v5705_v32 = vsel %vm1284_vm3, %v7556_v18, 0.0  ;;  %v6086_v15 = vld [vmem:[%s8595_s2 + $0x20] sm:$0xff]  ;;  %v6317_v18 = vld [vmem:[%s8595_s2 + $0x68] sm:$0xff] }
 0xa86   : > { %v5603_v26 = vpop.f32.mrf.mxu0  ;;  %v5684_v27 = vpop.f32.mrf.mxu1  ;;  %v5704_v28 = vadd.f32 %v5703_v22, %v5702_v19  ;;  %v6316_v19 = vld [vmem:[%s8595_s2 + $0x60] sm:$0xff] }
 0xa87   : > { %v5696_v29 = vsel %vm1280_vm0, %v5603_v26, 0.0  ;;  %v5698_v31 = vsel %vm1280_vm0, %v5684_v27, 0.0  ;;  %v6914_v22 = vld [vmem:[%s8597_s11] ss:$0 sm:$0xff] }
 0xa88   : > { %v5697_v30 = vadd.f32 %v5696_v29, %v5695_v25  ;;  %v5706_v34 = vadd.f32 %v5705_v32, %v5704_v28 }
 0xa8a   : > { %v5699_v33 = vadd.f32 %v5698_v31, %v5697_v30  ;;  %v7574_v9 = vpop.f32.mrf.mxu1 }
 0xa8c   : > { %7563 = vmatprep.mubr.msk.f32.mxu0 %vm1280_vm0, %v5699_v33  ;;  %v5860_v42 = vpop.f32.mrf.mxu1 }
 0xa8d   : > { %7564 = vmatmul.mubr.msk.f32.vlgmr.msra.gmra.mxu0 %vm1280_vm0, %v5706_v34 }
 0xa8e   : > { %7579 = vmatprep.mubr.msk.f32.mxu0 %vm7820_vm15, %v7819_v63  ;;  %7576 = vmatpush3.msra.mxu0 %v5905_v38 }
 0xa8f   : > { %7577 = vmatprep.subr.mxu0 %v7819_v63 }
 0xa90   : > { %7578 = vmatpush3.msra.mxu0 %v5904_v39  ;;  %v1193_v39 = vld [vmem:[%s1183_s28] sm:$0x1] }
 0xa91   : > { %7580 = vmatmul.mubr.msk.f32.vlgmr.msra.gmra.mxu0 %vm1325_vm1, %v5903_v59  ;;  %7591 = vmatprep.subr.mxu0 %v7819_v63  ;;  %vm6073_vm1 = vcmask 257024   ;;  %v6394_v59 = vld [vmem:[%s8595_s2 + $0x80] sm:$0xf] }
 0xa92   : > { %7599 = vmatprep.mubr.msk.f32.mxu0 %vm7820_vm15, %v7819_v63  ;;  %7592 = vmatpush3.msra.mxu0 %v6089_v4 }
 0xa93   : > { %7593 = vmatprep.subr.mxu0 %v7819_v63 }
 0xa94   : > { %7594 = vmatpush3.msra.mxu0 %v6088_v10 }
 0xa95   : > { %7595 = vmatprep.subr.mxu0 %v7819_v63 }
 0xa96   : > { %7596 = vmatpush3.msra.mxu0 %v6087_v13 }
 0xa97   : > { %7597 = vmatprep.subr.mxu0 %v7819_v63 }
 0xa98   : > { %7598 = vmatpush3.msra.mxu0 %v6086_v15 }
 0xa99   : > { %7613 = vmatprep.subr.mxu0 %v7819_v63 }
 0xb4d   : > { %v7565_v41 = vpop.f32.mrf.mxu0 }
 0xb4e   : > { %v5866_v60 = vadd.f32 %v7574_v9, %v7565_v41  ;;  %v6479_v41 = vld [vmem:[%s8004_s17 + $0x18] sm:$0xff] }
 0xb4f   : > { %v5785_v43 = vpop.f32.mrf.mxu0 }
 0xb50   : > { %v5876_v44 = vadd.f32 %v6910_v40, %v5866_v60  ;;  %v5861_v56 = vadd.f32 %v5860_v42, %v5785_v43  ;;  %v6478_v60 = vld [vmem:[%s8004_s17 + $0x10] sm:$0xff]  ;;  %v6480_v42 = vld [vmem:[%s8004_s17 + $0x20] sm:$0xf]  ;;  %v6477_v43 = vld [vmem:[%s8004_s17 + $0x8] sm:$0xff] }
 0xb51   : > { %v5976_v6 = vpop.f32.mrf.mxu0 }
 0xb52   : > { %v6912_v45 = vmul.f32 -1.442695, %v5876_v44  ;;  %v5875_v46 = vadd.f32 %v6910_v40, %v5861_v56  ;;  %v8482_v8 = vadd.f32 %v5976_v6, %v5906_v5  ;;  %v6476_v44 = vld [vmem:[%s8004_s17] sm:$0xff] }
 0xb53   : > { %v7581_v12 = vpop.f32.mrf.mxu0 }
 0xb54   : > { %7765 = vpow2.f32 %v6912_v45  ;;  %v6911_v20 = vmul.f32 -1.442695, %v5875_v46 }
 0xb56   : > { %7767 = vpow2.f32 %v6911_v20 }
 0xb61   : > { %v7766_v21 = vpop.eup %7765 }
 0xb62   : > { %v5884_v47 = vadd.f32 1.0, %v7766_v21 }
 0xb63   : > { %v7768_v48 = vpop.eup %7767 }
 0xb64   : > { %7769 = vrcp.f32 %v5884_v47  ;;  %v5883_v49 = vadd.f32 1.0, %v7768_v48 }
 0xb66   : > { %7771 = vrcp.f32 %v5883_v49 }
 0xb71   : > { %v7770_v50 = vpop.eup %7769 }
 0xb72   : > { %v5892_v23 = vsub.f32 1.0, %v7770_v50  ;;  %v5890_v62 = vmul.f32 %v7770_v50, %v8263_v17  ;;  %v6083_v17 = vld [vmem:[%s8595_s2 + $0x8] sm:$0xff] }
 0xb73   : > { %v7772_v24 = vpop.eup %7771 }
 0xb74   : > { %v5891_v51 = vsub.f32 1.0, %v7772_v24  ;;  %v5894_v53 = vmul.f32 %v5892_v23, %v5706_v34  ;;  %v5889_v57 = vmul.f32 %v7772_v24, %v8261_v16  ;;  %v6084_v16 = vld [vmem:[%s8595_s2 + $0x10] sm:$0xff]  ;;  %v6473_v24 = vld [vmem:[%s7999_s21] sm:$0x1] }
 0xb76   : > { %v5893_v58 = vmul.f32 %v5891_v51, %v5699_v33  ;;  %v5896_v2 = vadd.f32 %v5894_v53, %v5890_v62 }
 0xb78   : > { %v5895_v1 = vadd.f32 %v5893_v58, %v5889_v57 }
 0xb7a   : > { %7588 = vmatprep.mubr.msk.f32.mxu1 %vm1280_vm0, %v5895_v1 }
 0xb7b   : > { %7589 = vmatmul.mubr.msk.f32.vlgmr.msra.gmra.mxu1 %vm1280_vm0, %v5896_v2  ;;  %vm6071_vm0 = vcmask 261120   ;;  %v6627_v2 = vld [vmem:[#allocation2] sm:$0x1] }
 0xb7c   : > { %7610 = vmatprep.mubr.msk.f32.mxu1 %vm7820_vm15, %v7819_v63  ;;  %7603 = vmatpush3.msra.mxu1 %v6085_v3 }
 0xb7d   : > { %7604 = vmatprep.subr.mxu1 %v7819_v63 }
 0xb7e   : > { %7605 = vmatpush3.msra.mxu1 %v6084_v16 }
 0xb7f   : > { %7606 = vmatprep.subr.mxu1 %v7819_v63 }
 0xb80   : > { %7607 = vmatpush3.msra.mxu1 %v6083_v17 }
 0xb81   : > { %7608 = vmatprep.subr.mxu1 %v7819_v63 }
 0xb82   : > { %7609 = vmatpush3.msra.mxu1 %v6082_v7 }
 0xb83   : > { %7624 = vmatprep.subr.mxu1 %v7819_v63  ;;  %7611 = vmatmul.mubr.msk.f32.vlgmr.msra.gmra.mxu1 %vm6071_vm0, %v8482_v8 }
 0xb84   : > { %7625 = vmatpush3.msra.mxu1 %v6319_v11  ;;  %7632 = vmatprep.mubr.msk.f32.mxu1 %vm7820_vm15, %v7819_v63 }
 0xb85   : > { %7626 = vmatprep.subr.mxu1 %v7819_v63 }
 0xb86   : > { %7627 = vmatpush3.msra.mxu1 %v6318_v14 }
 0xb87   : > { %7628 = vmatprep.subr.mxu1 %v7819_v63 }
 0xb88   : > { %7629 = vmatpush3.msra.mxu1 %v6317_v18 }
 0xb89   : > { %7630 = vmatprep.subr.mxu1 %v7819_v63 }
 0xb8a   : > { %7631 = vmatpush3.msra.mxu1 %v6316_v19 }
 0xb8b   : > { %7640 = vmatprep.subr.mxu1 %v7819_v63 }
 0xc3b   : > { %v7590_v25 = vpop.f32.mrf.mxu1 }
 0xc3c   : > { %v6068_v26 = vadd.f32 %v7590_v25, %v6914_v22 }
 0xc3d   : > { %v6062_v27 = vpop.f32.mrf.mxu1 }
 0xc3e   : > { %v6063_v28 = vadd.f32 %v6914_v22, %v6062_v27  ;;  %v6074_v29 = vsel %vm6073_vm1, %v6068_v26, 0.0 }
 0xc40   : > { %v6072_v30 = vsel %vm6071_vm0, %v6063_v28, 0.0 }
 0xc41   : > { %v6075_v31 = vadd.f32 %v6074_v29, %v6072_v30 }
 0xc43   : > { %v6076_v32 = vrot.slane %v6075_v31, 4  ;;  %v6232_v9 = vpop.f32.mrf.mxu1 }
 0xc45   : > { %v6077_v33 = vadd.f32 %v6076_v32, %v6075_v31  ;;  %v7612_v40 = vpop.f32.mrf.mxu1 }
 0xc47   : > { %v6078_v34 = vrot.slane %v6077_v33, 2 }
 0xc49   : > { %v6079_v52 = vadd.f32 %v6078_v34, %v6077_v33 }
 0xc4b   : > { %v6080_v54 = vrot.slane %v6079_v52, 1 }
 0xc4d   : > { %v6081_v35 = vadd.f32 %v6080_v54, %v6079_v52 }
 0xc4f   : > { %v6315_v55 = vmul.f32 %v6081_v35, %v8482_v8  ;;  %7600 = vmatmul.mubr.msk.f32.vlgmr.msra.gmra.mxu0 %vm6071_vm0, %v6081_v35  ;;  %v6236_v38 = vsub.f32 %v6081_v35, %v8482_v8 }
 0xc50   : > { %7614 = vmatpush3.msra.mxu0 %v6240_v36  ;;  %7621 = vmatprep.mubr.msk.f32.mxu0 %vm7820_vm15, %v7819_v63 }
 0xc51   : > { %7615 = vmatprep.subr.mxu0 %v7819_v63  ;;  %7633 = vmatmul.mubr.msk.f32.vlgmr.msra.gmra.mxu1 %vm6071_vm0, %v6315_v55 }
 0xc52   : > { %7616 = vmatpush3.msra.mxu0 %v6239_v37  ;;  %7642 = vmatprep.mubr.msk.f32.mxu1 %vm7820_vm15, %v7819_v63 }
 0xc53   : > { %7617 = vmatprep.subr.mxu0 %v7819_v63  ;;  %7641 = vmatpush3.msk.msra.mxu1 %vm5038_vm10, %v6480_v42 }
 0xc54   : > { %7618 = vmatpush3.msra.mxu0 %v6238_v61 }
 0xc55   : > { %7619 = vmatprep.subr.mxu0 %v7819_v63  ;;  %7643 = vmatmul.mubr.msk.f32.vlgmr.msra.gmra.mxu1 %vm6395_vm2, %v1193_v39 }
 0xc56   : > { %7620 = vmatpush3.msra.mxu0 %v6237_v0 }
 0xc57   : > { %7622 = vmatmul.mubr.msk.f32.vlgmr.msra.gmra.mxu0 %vm6071_vm0, %v6236_v38  ;;  %7635 = vmatprep.subr.mxu0 %v7819_v63 }
 0xc58   : > { %7636 = vmatpush3.msk.msra.mxu0 %vm5038_vm10, %v6394_v59  ;;  %7637 = vmatprep.mubr.msk.f32.mxu0 %vm7820_vm15, %v7819_v63 }
 0xc59   : > { %7645 = vmatprep.subr.mxu0 %v7819_v63 }
 0xc5b   : > { %7638 = vmatmul.mubr.msk.f32.vlgmr.msra.gmra.mxu0 %vm6395_vm2, %v1193_v39 }
 0xc5c   : > { %7653 = vmatprep.mubr.msk.f32.mxu0 %vm7820_vm15, %v7819_v63  ;;  %7646 = vmatpush3.msra.mxu0 %v6479_v41 }
 0xc5d   : > { %7647 = vmatprep.subr.mxu0 %v7819_v63 }
 0xc5e   : > { %7648 = vmatpush3.msra.mxu0 %v6478_v60 }
 0xc5f   : > { %7649 = vmatprep.subr.mxu0 %v7819_v63 }
 0xc60   : > { %7650 = vmatpush3.msra.mxu0 %v6477_v43 }
 0xc61   : > { %7651 = vmatprep.subr.mxu0 %v7819_v63 }
 0xc62   : > { %7652 = vmatpush3.msra.mxu0 %v6476_v44 }
 0xd0f   : > { %v6159_v56 = vpop.f32.mrf.mxu0 }
 0xd10   : > { %v6233_v21 = vadd.f32 %v6232_v9, %v6159_v56 }
 0xd11   : > { %v7601_v45 = vpop.f32.mrf.mxu0  ;;  %v6389_v46 = vpop.f32.mrf.mxu1 }
 0xd13   : > { %v7634_v20 = vpop.f32.mrf.mxu1 }
 0xd15   : > { %v6550_v58 = vpop.f32.mrf.mxu1 }
 0xd17   : > { %v6310_v47 = vpop.f32.mrf.mxu0  ;;  %v7644_v62 = vpop.f32.mrf.mxu1 }
 0xd18   : > { %v6314_v48 = vadd.f32 %v6310_v47, %v6233_v21 }
 0xd19   : > { %v7623_v49 = vpop.f32.mrf.mxu0 }
 0xd1a   : > { %v6393_v50 = vadd.f32 %v6389_v46, %v6314_v48 }
 0xd1b   : > { %v6468_v23 = vpop.f32.mrf.mxu0 }
 0xd1c   : > { %v6472_v51 = vadd.f32 %v6468_v23, %v6393_v50 }
 0xd1d   : > { %v7639_v53 = vpop.f32.mrf.mxu0 }
 0xd1e   : > { %v6474_v63 = vadd.f32 %v6473_v24, %v6472_v51 }
 0xd20   : > { %v6475_v57 = vmax.f32 %v6474_v63, 0.0 }
 0xd22   : > { %7654 = vmatmul.mubr.msk.f32.vlgmr.msra.gmra.mxu0 %vm6071_vm0, %v6475_v57 }
 0xde2   : > { %v6623_v1 = vpop.f32.mrf.mxu0 }
 0xde3   : > { %v6624_v3 = vadd.f32 %v6623_v1, %v6550_v58 }
 0xde4   : > { %v7655_v16 = vpop.f32.mrf.mxu0 }
 0xde5   : > { %v6628_v17 = vadd.f32 %v6627_v2, %v6624_v3 }
 0xde7   : > { %6631 = vperm.xlu0 %7704, %v6628_v17  }
 0xe62   : > { %v6632_v4 = vpop.permute.xlu0 %6631 }
 0xe63   : > { %6634 = vst [vmem:[%s1186_s27] sm:$0x1] %v6632_v4 }
 0xe64 PF: > { %s87_s7 = sadd.s32 1, %s7779_s7  }
 0xe65   : > { %p84_p4 = scmp.ge.s32.totalorder %s87_s7, 4  }
 0xe67   :  { %86 = sbr.rel (!%p84_p4) target bundleno = 75 (0x4b), region = 247 }

</bundles_post_ra>
